<compile_context>
chip_gen: v5e
topology: v5e:2x2
jax: 0.10.0
libtpu: 0.0.40
codegen_flags: <defaults>
</compile_context>

<pallas_src>
import functools

import jax
import jax.numpy as jnp
from jax import lax
from jax.experimental import pallas as pl
from jax.experimental.pallas import tpu as pltpu

_TARGET_F32_SLAB_BYTES = 2 << 20      # per-strip f32 working slab target (~2 MiB)
_PATH2_MAX_F32_SLAB_BYTES = 4 << 20   # single-strip limit for the flattened C path
_VMEM_LIMIT_BYTES = 48 * 1024 * 1024  # < v7x 64 MiB physical, > v5e 16 MiB default


def _dwconv_kernel(*refs, h_tile, w_len, w_stride, has_halo, fuse_gelu):
    """3x3 depthwise stencil over one (h_tile, ...) strip.

    Lane layout:
      * has_halo=True  ("channel" path): blocks are (h_tile, W, ct); ct on lanes,
        W on sublanes, H major; horizontal shift = sublane roll by 1.
      * has_halo=False ("flattened" path, single strip): blocks are (H, W*C);
        W*C on lanes; horizontal shift = lane roll by C (w_stride).
    """
    if has_halo:
        x_ref, top_ref, bot_ref, w_ref, b_ref, o_ref, stage_ref = refs
    else:
        x_ref, w_ref, b_ref, o_ref, stage_ref = refs

    f32 = jnp.float32

    # Stage the strip (+ its vertical halo rows) into one f32 scratch so the three
    # vertically shifted views are plain overlapping reads (no concat slab copies,
    # and the bf16->f32 cast happens exactly once).
    stage_ref[pl.ds(1, h_tile)] = x_ref[0].astype(f32)
    if has_halo:
        hi = pl.program_id(2)
        n_ht = pl.num_programs(2)
        top = top_ref[0].astype(f32)
        bot = bot_ref[0].astype(f32)
        # pad=1 semantics: zero the halo rows at the image boundary.
        stage_ref[pl.ds(0, 1)] = jnp.where(hi > 0, top, 0.0)
        stage_ref[pl.ds(h_tile + 1, 1)] = jnp.where(hi < n_ht - 1, bot, 0.0)
    else:
        zero_row = jnp.zeros((1,) + stage_ref.shape[1:], f32)
        stage_ref[pl.ds(0, 1)] = zero_row
        stage_ref[pl.ds(h_tile + 1, 1)] = zero_row

    x_up = stage_ref[pl.ds(0, h_tile)]   # input row r-1
    x_mid = stage_ref[pl.ds(1, h_tile)]  # input row r
    x_dn = stage_ref[pl.ds(2, h_tile)]   # input row r+1

    w = w_ref[...].astype(f32)           # (3, 3, L)
    bias = b_ref[0].astype(f32)          # (L,)

    # Column-offset partial sums: t_dw(r, w) = sum_dh k[dh, dw] * x(r+dh-1, w).
    # Bias folded into the center column (saves one full-slab VALU pass).
    t0 = x_up * w[0, 0] + x_mid * w[1, 0] + x_dn * w[2, 0]
    t1 = x_up * w[0, 1] + x_mid * w[1, 1] + x_dn * w[2, 1] + bias
    t2 = x_up * w[0, 2] + x_mid * w[1, 2] + x_dn * w[2, 2]

    # Horizontal +/-1 shifts: XLU rolls (non-negative shifts only) plus hoisted
    # edge masks (one tiny iota) zeroing the wrapped-around w column.
    axis_size = w_len * w_stride
    mask_shape = (1, axis_size) + (1,) * (t0.ndim - 2)
    pos = lax.broadcasted_iota(jnp.int32, mask_shape, 1)
    not_first = pos >= w_stride                 # w > 0
    not_last = pos < axis_size - w_stride       # w < W - 1

    left = jnp.where(not_first, pltpu.roll(t0, shift=w_stride, axis=1), 0.0)
    right = jnp.where(not_last,
                      pltpu.roll(t2, shift=axis_size - w_stride, axis=1), 0.0)

    y = left + t1 + right
    if fuse_gelu:
        y = jax.nn.gelu(y, approximate=True)    # EUP tanh; free on a mem-bound kernel
    o_ref[0] = y.astype(o_ref.dtype)


def _pick_c_tile(C):
    for ct in (256, 128):
        if C % ct == 0:
            return ct
    return None


def _pick_h_tile(H, W, ct, target_f32_slab_bytes=_TARGET_F32_SLAB_BYTES):
    """Rows per strip so one f32 slab (h_tile, W, ct) is <= ~2 MiB."""
    rows = max(1, target_f32_slab_bytes // (W * ct * 4))
    if rows >= H:
        return H
    # Prefer a divisor of H near the budget (no H padding pass needed); otherwise
    # take the budget-sized strip and let the wrapper pad H by <= h_tile-1 rows.
    best_div = 1
    for d in range(1, rows + 1):
        if H % d == 0:
            best_div = d
    if 2 * best_div >= rows:
        return best_div
    return rows


def dwconv_pallas(x_bnc, weight_33c, bias_c, H, W, *, h_tile=None, fuse_gelu=False):
    """x_bnc: (B, N=H*W, C) -> (B, N, C); depthwise 3x3 conv, stride 1, pad 1.

    weight_33c: (3, 3, C)  (== PyTorch (C, 1, 3, 3) transposed);  bias_c: (C,).
    fuse_gelu=True additionally applies tanh-GELU to the output (MiT Mlp fusion).
    """
    B, N, C = x_bnc.shape
    assert N == H * W
    io_dtype = x_bnc.dtype
    ct = _pick_c_tile(C)

    # ---- Path 2: lane-dense fallback when C % 128 != 0 --------------------------
    # Fold W into the lane axis so stores stay unmasked and lanes stay full.
    if ct is None and h_tile is None and H * W * C * 4 <= _PATH2_MAX_F32_SLAB_BYTES:
        WC = W * C
        x = x_bnc.reshape(B, H, WC)                       # free reshape (row-major)
        w_flat = jnp.tile(weight_33c, (1, 1, W))          # (3, 3, W*C): idx w*C+c -> k[..., c]
        b_flat = jnp.tile(bias_c, W).reshape(1, WC)
        kernel = functools.partial(_dwconv_kernel, h_tile=H, w_len=W, w_stride=C,
                                   has_halo=False, fuse_gelu=fuse_gelu)
        out = pl.pallas_call(
            kernel,
            out_shape=jax.ShapeDtypeStruct((B, H, WC), io_dtype),
            grid_spec=pltpu.PrefetchScalarGridSpec(
                num_scalar_prefetch=0,
                grid=(B,),
                in_specs=[
                    pl.BlockSpec((1, H, WC), lambda b: (b, 0, 0)),
                    pl.BlockSpec((3, 3, WC), lambda b: (0, 0, 0)),
                    pl.BlockSpec((1, WC), lambda b: (0, 0)),
                ],
                out_specs=pl.BlockSpec((1, H, WC), lambda b: (b, 0, 0)),
                scratch_shapes=[pltpu.VMEM((H + 2, WC), jnp.float32)],
            ),
            compiler_params=pltpu.CompilerParams(
                dimension_semantics=("parallel",),
                vmem_limit_bytes=_VMEM_LIMIT_BYTES,
            ),
        )(x, w_flat, b_flat)
        return out.reshape(B, N, C)

    # ---- Path 1: lane-dense channel tiles (C % 128 == 0), H strips --------------
    if ct is None:
        # TODO(synk): lane-sparse (masked-store) path for C % 128 != 0 with images
        # too large for the single-strip flattened fallback; pad C at the model
        # level once if this shows up hot.
        ct = C

    x = x_bnc.reshape(B, H, W, C)                         # free reshape == NHWC
    if h_tile is None:
        h_tile = _pick_h_tile(H, W, ct)
    h_tile = min(h_tile, H)
    n_ht = pl.cdiv(H, h_tile)
    H_pad = n_ht * h_tile
    if H_pad != H:
        # <= h_tile-1 zero rows at the bottom; padded rows are sliced off below.
        x = jnp.pad(x, ((0, 0), (0, H_pad - H), (0, 0), (0, 0)))
    n_ct = C // ct

    kernel = functools.partial(_dwconv_kernel, h_tile=h_tile, w_len=W, w_stride=1,
                               has_halo=True, fuse_gelu=fuse_gelu)

    # Body blocks are h_tile-row strips (block index hi). The two halo inputs use
    # 1-row blocks along the major H axis, so their H block index is a *row*
    # index (clamped; boundary rows are zero-masked in-kernel).
    body_map = lambda b, ci, hi: (b, hi, 0, ci)
    top_map = lambda b, ci, hi: (b, jnp.maximum(hi * h_tile - 1, 0), 0, ci)
    bot_map = lambda b, ci, hi: (b, jnp.minimum(hi * h_tile + h_tile, H_pad - 1), 0, ci)

    out_nhwc = pl.pallas_call(
        kernel,
        out_shape=jax.ShapeDtypeStruct((B, H_pad, W, C), io_dtype),
        grid_spec=pltpu.PrefetchScalarGridSpec(
            num_scalar_prefetch=0,
            grid=(B, n_ct, n_ht),
            in_specs=[
                pl.BlockSpec((1, h_tile, W, ct), body_map),
                pl.BlockSpec((1, 1, W, ct), top_map),
                pl.BlockSpec((1, 1, W, ct), bot_map),
                pl.BlockSpec((3, 3, ct), lambda b, ci, hi: (0, 0, ci)),
                pl.BlockSpec((1, ct), lambda b, ci, hi: (0, ci)),
            ],
            out_specs=pl.BlockSpec((1, h_tile, W, ct), body_map),
            scratch_shapes=[pltpu.VMEM((h_tile + 2, W, ct), jnp.float32)],
        ),
        compiler_params=pltpu.CompilerParams(
            # All axes independent (no cross-step carry) -> megacore can shard
            # any of them on v7x; B is outermost.
            dimension_semantics=("parallel", "parallel", "parallel"),
            vmem_limit_bytes=_VMEM_LIMIT_BYTES,
        ),
    )(x, x, x, weight_33c, bias_c.reshape(1, C))

    if H_pad != H:
        out_nhwc = out_nhwc[:, :H]
    return out_nhwc.reshape(B, N, C)


def dwconv_reference(x_bnc, weight_33c, bias_c, H, W):
    """Exact f32 reference matching PyTorch NCHW depthwise Conv2d (cross-correlation)."""
    B, N, C = x_bnc.shape
    x = x_bnc.reshape(B, H, W, C).astype(jnp.float32)
    xp = jnp.pad(x, ((0, 0), (1, 1), (1, 1), (0, 0)))
    w = weight_33c.astype(jnp.float32)
    y = jnp.zeros_like(x)
    for dh in range(3):
        for dw in range(3):
            y = y + xp[:, dh:dh + H, dw:dw + W, :] * w[dh, dw]
    y = y + bias_c.astype(jnp.float32)
    return y.reshape(B, N, C)


if __name__ == "__main__":
    root = jax.random.PRNGKey(0)

    cases = [
        # (B,  C,  H,  W, dtype,        h_tile, fuse_gelu, atol, rtol)
        (2, 128, 16, 16, jnp.float32,  None,  False, 1e-5, 1e-5),  # single strip
        (2, 128, 16, 16, jnp.float32,  8,     False, 1e-5, 1e-5),  # multi-strip halo
        (2, 128, 16, 16, jnp.float32,  6,     False, 1e-5, 1e-5),  # cdiv + H padding
        (2,  64, 12, 12, jnp.float32,  None,  False, 1e-5, 1e-5),  # C%128!=0 -> flattened lanes
        (2, 128, 16, 16, jnp.bfloat16, 8,     False, 3e-2, 3e-2),  # bf16 I/O, f32 accumulation
        (2, 128, 16, 16, jnp.float32,  8,     True,  1e-5, 1e-5),  # fused GELU epilogue
    ]

    for idx, (B, C, H, W, dtype, ht, fuse_gelu, atol, rtol) in enumerate(cases):
        kx, kw, kb = jax.random.split(jax.random.fold_in(root, idx), 3)
        x = jax.random.normal(kx, (B, H * W, C), dtype=jnp.float32)
        # nn.Conv2d(dim, dim, 3, groups=dim): weight (dim, 1, 3, 3) -> stored as (3, 3, dim)
        w = jax.random.normal(kw, (3, 3, C), dtype=jnp.float32) * 0.1
        b = jax.random.normal(kb, (C,), dtype=jnp.float32) * 0.1
        x, w, b = x.astype(dtype), w.astype(dtype), b.astype(dtype)

        out = dwconv_pallas(x, w, b, H, W, h_tile=ht, fuse_gelu=fuse_gelu)
        out = jax.block_until_ready(out)

        ref = dwconv_reference(x, w, b, H, W)
        if fuse_gelu:
            ref = jax.nn.gelu(ref, approximate=True)

        assert out.shape == (B, H * W, C)
        assert jnp.allclose(out.astype(jnp.float32), ref, atol=atol, rtol=rtol), \
            f"mismatch vs reference in case {idx}"

    print("KERNEL_OK")
</pallas_src>

<mosaic_0001>
module attributes {stable_mosaic.version = 11 : i64} {
  func.func @_dwconv_kernel(%arg0: i32, %arg1: i32, %arg2: i32, %arg3: memref<1x16x16x128xf32, #tpu.memory_space<vmem>>, %arg4: memref<1x1x16x128xf32, #tpu.memory_space<vmem>>, %arg5: memref<1x1x16x128xf32, #tpu.memory_space<vmem>>, %arg6: memref<3x3x128xf32, #tpu.memory_space<vmem>>, %arg7: memref<1x128xf32, #tpu.memory_space<vmem>>, %arg8: memref<1x16x16x128xf32, #tpu.memory_space<vmem>>, %arg9: memref<18x16x128xf32, #tpu.memory_space<vmem>>) attributes {dimension_semantics = [#tpu.dimension_semantics<parallel>, #tpu.dimension_semantics<parallel>, #tpu.dimension_semantics<parallel>], iteration_bounds = array<i64: 2, 1, 1>, scalar_prefetch = 0 : i64, scratch_operands = 1 : i64, tpu.core_type = #tpu.core_type<tc>, window_params = [{transform_indices = @transform_0, window_bounds = array<i64: 1, 16, 16, 128>}, {transform_indices = @transform_1, window_bounds = array<i64: 1, 1, 16, 128>}, {transform_indices = @transform_2, window_bounds = array<i64: 1, 1, 16, 128>}, {transform_indices = @transform_3, window_bounds = array<i64: 3, 3, 128>}, {transform_indices = @transform_4, window_bounds = array<i64: 1, 128>}, {transform_indices = @transform_5, window_bounds = array<i64: 1, 16, 16, 128>}]} {
    %c0 = arith.constant 0 : index
    %c0_0 = arith.constant 0 : index
    %c0_1 = arith.constant 0 : index
    %c0_2 = arith.constant 0 : index
    %0 = vector.load %arg3[%c0, %c0_0, %c0_1, %c0_2] : memref<1x16x16x128xf32, #tpu.memory_space<vmem>>, vector<1x16x16x128xf32>
    %1 = vector.shape_cast %0 : vector<1x16x16x128xf32> to vector<16x16x128xf32>
    %c1 = arith.constant 1 : index
    %c0_3 = arith.constant 0 : index
    %c0_4 = arith.constant 0 : index
    %2 = vector.load %arg9[%c1, %c0_3, %c0_4] : memref<18x16x128xf32, #tpu.memory_space<vmem>>, vector<16x16x128xf32>
    tpu.vector_store %arg9[%c1, %c0_3, %c0_4], %1 {strides = array<i32>} : memref<18x16x128xf32, #tpu.memory_space<vmem>>, vector<16x16x128xf32>,
    %c0_5 = arith.constant 0 : index
    %c0_6 = arith.constant 0 : index
    %c0_7 = arith.constant 0 : index
    %c0_8 = arith.constant 0 : index
    %3 = vector.load %arg4[%c0_5, %c0_6, %c0_7, %c0_8] : memref<1x1x16x128xf32, #tpu.memory_space<vmem>>, vector<1x1x16x128xf32>
    %4 = vector.shape_cast %3 : vector<1x1x16x128xf32> to vector<1x16x128xf32>
    %c0_9 = arith.constant 0 : index
    %c0_10 = arith.constant 0 : index
    %c0_11 = arith.constant 0 : index
    %c0_12 = arith.constant 0 : index
    %5 = vector.load %arg5[%c0_9, %c0_10, %c0_11, %c0_12] : memref<1x1x16x128xf32, #tpu.memory_space<vmem>>, vector<1x1x16x128xf32>
    %6 = vector.shape_cast %5 : vector<1x1x16x128xf32> to vector<1x16x128xf32>
    %c0_i32 = arith.constant 0 : i32
    %7 = arith.cmpi sgt, %arg2, %c0_i32 : i32
    %cst = arith.constant 0.000000e+00 : f32
    %8 = vector.broadcast %cst : f32 to vector<1x16x128xf32>
    %9 = arith.select %7, %4, %8 : vector<1x16x128xf32>
    %c0_13 = arith.constant 0 : index
    %c0_14 = arith.constant 0 : index
    %c0_15 = arith.constant 0 : index
    %10 = vector.load %arg9[%c0_13, %c0_14, %c0_15] : memref<18x16x128xf32, #tpu.memory_space<vmem>>, vector<1x16x128xf32>
    tpu.vector_store %arg9[%c0_13, %c0_14, %c0_15], %9 {strides = array<i32>} : memref<18x16x128xf32, #tpu.memory_space<vmem>>, vector<1x16x128xf32>,
    %c0_i32_16 = arith.constant 0 : i32
    %11 = arith.cmpi slt, %arg2, %c0_i32_16 : i32
    %cst_17 = arith.constant 0.000000e+00 : f32
    %12 = vector.broadcast %cst_17 : f32 to vector<1x16x128xf32>
    %13 = arith.select %11, %6, %12 : vector<1x16x128xf32>
    %c17 = arith.constant 17 : index
    %c0_18 = arith.constant 0 : index
    %c0_19 = arith.constant 0 : index
    %14 = vector.load %arg9[%c17, %c0_18, %c0_19] : memref<18x16x128xf32, #tpu.memory_space<vmem>>, vector<1x16x128xf32>
    tpu.vector_store %arg9[%c17, %c0_18, %c0_19], %13 {strides = array<i32>} : memref<18x16x128xf32, #tpu.memory_space<vmem>>, vector<1x16x128xf32>,
    %c0_20 = arith.constant 0 : index
    %c0_21 = arith.constant 0 : index
    %c0_22 = arith.constant 0 : index
    %15 = vector.load %arg9[%c0_20, %c0_21, %c0_22] : memref<18x16x128xf32, #tpu.memory_space<vmem>>, vector<16x16x128xf32>
    %c1_23 = arith.constant 1 : index
    %c0_24 = arith.constant 0 : index
    %c0_25 = arith.constant 0 : index
    %16 = vector.load %arg9[%c1_23, %c0_24, %c0_25] : memref<18x16x128xf32, #tpu.memory_space<vmem>>, vector<16x16x128xf32>
    %c2 = arith.constant 2 : index
    %c0_26 = arith.constant 0 : index
    %c0_27 = arith.constant 0 : index
    %17 = vector.load %arg9[%c2, %c0_26, %c0_27] : memref<18x16x128xf32, #tpu.memory_space<vmem>>, vector<16x16x128xf32>
    %c0_28 = arith.constant 0 : index
    %c0_29 = arith.constant 0 : index
    %c0_30 = arith.constant 0 : index
    %18 = vector.load %arg6[%c0_28, %c0_29, %c0_30] : memref<3x3x128xf32, #tpu.memory_space<vmem>>, vector<3x3x128xf32>
    %c0_31 = arith.constant 0 : index
    %c0_32 = arith.constant 0 : index
    %19 = vector.load %arg7[%c0_31, %c0_32] : memref<1x128xf32, #tpu.memory_space<vmem>>, vector<1x128xf32>
    %20 = vector.shape_cast %19 : vector<1x128xf32> to vector<128xf32>
    %21 = vector.extract_strided_slice %18 {offsets = [0, 0, 0], sizes = [1, 1, 128], strides = [1, 1, 1]} : vector<3x3x128xf32> to vector<1x1x128xf32>
    %22 = vector.shape_cast %21 : vector<1x1x128xf32> to vector<128xf32>
    %23 = vector.shape_cast %22 : vector<128xf32> to vector<1x1x128xf32>
    %24 = vector.broadcast %23 : vector<1x1x128xf32> to vector<16x16x128xf32>
    %25 = arith.mulf %15, %24 : vector<16x16x128xf32>
    %26 = vector.extract_strided_slice %18 {offsets = [1, 0, 0], sizes = [1, 1, 128], strides = [1, 1, 1]} : vector<3x3x128xf32> to vector<1x1x128xf32>
    %27 = vector.shape_cast %26 : vector<1x1x128xf32> to vector<128xf32>
    %28 = vector.shape_cast %27 : vector<128xf32> to vector<1x1x128xf32>
    %29 = vector.broadcast %28 : vector<1x1x128xf32> to vector<16x16x128xf32>
    %30 = arith.mulf %16, %29 : vector<16x16x128xf32>
    %31 = arith.addf %25, %30 : vector<16x16x128xf32>
    %32 = vector.extract_strided_slice %18 {offsets = [2, 0, 0], sizes = [1, 1, 128], strides = [1, 1, 1]} : vector<3x3x128xf32> to vector<1x1x128xf32>
    %33 = vector.shape_cast %32 : vector<1x1x128xf32> to vector<128xf32>
    %34 = vector.shape_cast %33 : vector<128xf32> to vector<1x1x128xf32>
    %35 = vector.broadcast %34 : vector<1x1x128xf32> to vector<16x16x128xf32>
    %36 = arith.mulf %17, %35 : vector<16x16x128xf32>
    %37 = arith.addf %31, %36 : vector<16x16x128xf32>
    %38 = vector.extract_strided_slice %18 {offsets = [0, 1, 0], sizes = [1, 1, 128], strides = [1, 1, 1]} : vector<3x3x128xf32> to vector<1x1x128xf32>
    %39 = vector.shape_cast %38 : vector<1x1x128xf32> to vector<128xf32>
    %40 = vector.shape_cast %39 : vector<128xf32> to vector<1x1x128xf32>
    %41 = vector.broadcast %40 : vector<1x1x128xf32> to vector<16x16x128xf32>
    %42 = arith.mulf %15, %41 : vector<16x16x128xf32>
    %43 = vector.extract_strided_slice %18 {offsets = [1, 1, 0], sizes = [1, 1, 128], strides = [1, 1, 1]} : vector<3x3x128xf32> to vector<1x1x128xf32>
    %44 = vector.shape_cast %43 : vector<1x1x128xf32> to vector<128xf32>
    %45 = vector.shape_cast %44 : vector<128xf32> to vector<1x1x128xf32>
    %46 = vector.broadcast %45 : vector<1x1x128xf32> to vector<16x16x128xf32>
    %47 = arith.mulf %16, %46 : vector<16x16x128xf32>
    %48 = arith.addf %42, %47 : vector<16x16x128xf32>
    %49 = vector.extract_strided_slice %18 {offsets = [2, 1, 0], sizes = [1, 1, 128], strides = [1, 1, 1]} : vector<3x3x128xf32> to vector<1x1x128xf32>
    %50 = vector.shape_cast %49 : vector<1x1x128xf32> to vector<128xf32>
    %51 = vector.shape_cast %50 : vector<128xf32> to vector<1x1x128xf32>
    %52 = vector.broadcast %51 : vector<1x1x128xf32> to vector<16x16x128xf32>
    %53 = arith.mulf %17, %52 : vector<16x16x128xf32>
    %54 = arith.addf %48, %53 : vector<16x16x128xf32>
    %55 = vector.shape_cast %20 : vector<128xf32> to vector<1x1x128xf32>
    %56 = vector.broadcast %55 : vector<1x1x128xf32> to vector<16x16x128xf32>
    %57 = arith.addf %54, %56 : vector<16x16x128xf32>
    %58 = vector.extract_strided_slice %18 {offsets = [0, 2, 0], sizes = [1, 1, 128], strides = [1, 1, 1]} : vector<3x3x128xf32> to vector<1x1x128xf32>
    %59 = vector.shape_cast %58 : vector<1x1x128xf32> to vector<128xf32>
    %60 = vector.shape_cast %59 : vector<128xf32> to vector<1x1x128xf32>
    %61 = vector.broadcast %60 : vector<1x1x128xf32> to vector<16x16x128xf32>
    %62 = arith.mulf %15, %61 : vector<16x16x128xf32>
    %63 = vector.extract_strided_slice %18 {offsets = [1, 2, 0], sizes = [1, 1, 128], strides = [1, 1, 1]} : vector<3x3x128xf32> to vector<1x1x128xf32>
    %64 = vector.shape_cast %63 : vector<1x1x128xf32> to vector<128xf32>
    %65 = vector.shape_cast %64 : vector<128xf32> to vector<1x1x128xf32>
    %66 = vector.broadcast %65 : vector<1x1x128xf32> to vector<16x16x128xf32>
    %67 = arith.mulf %16, %66 : vector<16x16x128xf32>
    %68 = arith.addf %62, %67 : vector<16x16x128xf32>
    %69 = vector.extract_strided_slice %18 {offsets = [2, 2, 0], sizes = [1, 1, 128], strides = [1, 1, 1]} : vector<3x3x128xf32> to vector<1x1x128xf32>
    %70 = vector.shape_cast %69 : vector<1x1x128xf32> to vector<128xf32>
    %71 = vector.shape_cast %70 : vector<128xf32> to vector<1x1x128xf32>
    %72 = vector.broadcast %71 : vector<1x1x128xf32> to vector<16x16x128xf32>
    %73 = arith.mulf %17, %72 : vector<16x16x128xf32>
    %74 = arith.addf %68, %73 : vector<16x16x128xf32>
    %75 = tpu.iota {dimensions = array<i32: 1>} : vector<1x16x1xi32>
    %c1_i32 = arith.constant 1 : i32
    %76 = vector.broadcast %c1_i32 : i32 to vector<1x16x1xi32>
    %77 = arith.cmpi sge, %75, %76 : vector<1x16x1xi32>
    %c15_i32 = arith.constant 15 : i32
    %78 = vector.broadcast %c15_i32 : i32 to vector<1x16x1xi32>
    %79 = arith.cmpi slt, %75, %78 : vector<1x16x1xi32>
    %c1_i32_33 = arith.constant 1 : i32
    %80 = tpu.dynamic_rotate %37 by %c1_i32_33 dim 1 : vector<16x16x128xf32>, i32 -> vector<16x16x128xf32>
    %cst_34 = arith.constant 0.000000e+00 : f32
    %81 = vector.shape_cast %77 : vector<1x16x1xi1> to vector<1x16x1xi1>
    %82 = vector.broadcast %81 : vector<1x16x1xi1> to vector<16x16x128xi1>
    %83 = vector.broadcast %cst_34 : f32 to vector<16x16x128xf32>
    %84 = arith.select %82, %80, %83 : vector<16x16x128xi1>, vector<16x16x128xf32>
    %c15_i32_35 = arith.constant 15 : i32
    %85 = tpu.dynamic_rotate %74 by %c15_i32_35 dim 1 : vector<16x16x128xf32>, i32 -> vector<16x16x128xf32>
    %cst_36 = arith.constant 0.000000e+00 : f32
    %86 = vector.shape_cast %79 : vector<1x16x1xi1> to vector<1x16x1xi1>
    %87 = vector.broadcast %86 : vector<1x16x1xi1> to vector<16x16x128xi1>
    %88 = vector.broadcast %cst_36 : f32 to vector<16x16x128xf32>
    %89 = arith.select %87, %85, %88 : vector<16x16x128xi1>, vector<16x16x128xf32>
    %90 = arith.addf %84, %57 : vector<16x16x128xf32>
    %91 = arith.addf %90, %89 : vector<16x16x128xf32>
    %c0_37 = arith.constant 0 : index
    %c0_38 = arith.constant 0 : index
    %c0_39 = arith.constant 0 : index
    %c0_40 = arith.constant 0 : index
    %92 = vector.load %arg8[%c0_37, %c0_38, %c0_39, %c0_40] : memref<1x16x16x128xf32, #tpu.memory_space<vmem>>, vector<1x16x16x128xf32>
    %93 = vector.shape_cast %92 : vector<1x16x16x128xf32> to vector<16x16x128xf32>
    %94 = vector.shape_cast %91 : vector<16x16x128xf32> to vector<1x16x16x128xf32>
    tpu.vector_store %arg8[%c0_37, %c0_38, %c0_39, %c0_40], %94 {strides = array<i32>} : memref<1x16x16x128xf32, #tpu.memory_space<vmem>>, vector<1x16x16x128xf32>,
    return
  }
  func.func @transform_0(%arg0: i32, %arg1: i32, %arg2: i32) -> (i32, i32, i32, i32) {
    %c0_i32 = arith.constant 0 : i32
    %c0_i32_0 = arith.constant 0 : i32
    return %arg0, %arg2, %c0_i32, %arg1 : i32, i32, i32, i32
  }
  func.func @transform_1(%arg0: i32, %arg1: i32, %arg2: i32) -> (i32, i32, i32, i32) {
    %c16_i32 = arith.constant 16 : i32
    %0 = arith.muli %arg2, %c16_i32 : i32
    %c1_i32 = arith.constant 1 : i32
    %1 = arith.subi %0, %c1_i32 : i32
    %c0_i32 = arith.constant 0 : i32
    %2 = arith.maxsi %1, %c0_i32 : i32
    %c0_i32_0 = arith.constant 0 : i32
    %c0_i32_1 = arith.constant 0 : i32
    return %arg0, %2, %c0_i32_0, %arg1 : i32, i32, i32, i32
  }
  func.func @transform_2(%arg0: i32, %arg1: i32, %arg2: i32) -> (i32, i32, i32, i32) {
    %c16_i32 = arith.constant 16 : i32
    %0 = arith.muli %arg2, %c16_i32 : i32
    %c16_i32_0 = arith.constant 16 : i32
    %1 = arith.addi %0, %c16_i32_0 : i32
    %c15_i32 = arith.constant 15 : i32
    %2 = arith.minsi %1, %c15_i32 : i32
    %c0_i32 = arith.constant 0 : i32
    %c0_i32_1 = arith.constant 0 : i32
    return %arg0, %2, %c0_i32, %arg1 : i32, i32, i32, i32
  }
  func.func @transform_3(%arg0: i32, %arg1: i32, %arg2: i32) -> (i32, i32, i32) {
    %c0_i32 = arith.constant 0 : i32
    %c0_i32_0 = arith.constant 0 : i32
    %c0_i32_1 = arith.constant 0 : i32
    return %c0_i32, %c0_i32_0, %arg1 : i32, i32, i32
  }
  func.func @transform_4(%arg0: i32, %arg1: i32, %arg2: i32) -> (i32, i32) {
    %c0_i32 = arith.constant 0 : i32
    %c0_i32_0 = arith.constant 0 : i32
    return %c0_i32, %arg1 : i32, i32
  }
  func.func @transform_5(%arg0: i32, %arg1: i32, %arg2: i32) -> (i32, i32, i32, i32) {
    %c0_i32 = arith.constant 0 : i32
    %c0_i32_0 = arith.constant 0 : i32
    return %arg0, %arg2, %c0_i32, %arg1 : i32, i32, i32, i32
  }
}

</mosaic_0001>

<bundles_post_ra>
// kernel: tpu_custom_call.1
= control target key start
LH: loop header
LB: loop body
LE: loop exit
PB: predicated region body
PF: predicated region fallthrough
CT: control target
= control target key end

     0   :  { %s3167_s0 = inlined_call_operand.hbm [shape: f32[2,16,16,128], index: 0, kind: input, shape index: {}]   ;;  %s3168_s1 = inlined_call_operand.hbm [shape: f32[2,16,16,128], index: 1, kind: input, shape index: {}]   ;;  %s3169_s2 = inlined_call_operand.hbm [shape: f32[2,16,16,128], index: 2, kind: input, shape index: {}]   ;;  %s3170_s3 = inlined_call_operand.hbm [shape: f32[3,3,128], index: 3, kind: input, shape index: {}]   ;;  %s3171_s4 = inlined_call_operand.vmem [shape: f32[1,128], index: 4, kind: input, shape index: {}]   ;;  %s3172_s5 = inlined_call_operand.hbm [shape: f32[2,16,16,128], index: 5, kind: output, shape index: {}]  }
   0x1   :  { %3184 = sst [smem:[#allocation23_spill]] %s3167_s0 }
   0x2   :  { %3185 = sst [smem:[#allocation24_spill]] %s3168_s1 }
   0x3   :  { %3186 = sst [smem:[#allocation25_spill]] %s3170_s3 }
   0x4   :  { %10 = vsyncpa [#allocation4], 0 }
   0x5   :  { %12 = vsyncpa [#allocation4 + $0x1], 0 }
   0x6   :  { %13 = vsyncpa [#allocation7], 0 }
   0x7   :  { %15 = vsyncpa [#allocation7 + $0x1], 0 }
   0x8   :  { %16 = vsyncpa [#allocation10], 0 }
   0x9   :  { %17 = vsyncpa [#allocation5], 0 }
   0xa   :  { %19 = vsyncpa [#allocation5 + $0x1], 0  ;;  %s2018_s18 = smov 0   ;;  %s2020_s19 = smov 0  }
   0xb   :  { %s2022_s20 = smov 0   ;;  %s2024_s21 = smov 0  }
   0xc   :  { %s2026_s22 = smov 0   ;;  %s2028_s23 = smov 0  }
   0xd LB: > { %3187 = sst [smem:[#allocation16_spill]] %s1959_s18  ;;  %s44_s24 = sadd.s32 1, %s1975_s22  ;;  %s1979_s23 = sphi %s2028_s23, %s25_s23   ;;  %s1975_s22 = sphi %s2026_s22, %s3211_s22   ;;  %s1971_s21 = sphi %s2024_s21, %s3210_s21   ;;  %s1967_s20 = sphi %s2022_s20, %s3209_s20   ;;  %s1963_s19 = sphi %s2020_s19, %s3213_s19   ;;  %s1959_s18 = sphi %s2018_s18, %s3212_s18  }
   0xe   : > { %3188 = sst [smem:[#allocation17_spill]] %s1967_s20  ;;  %s55_s25 = sadd.s32 1, %s1967_s20 }
   0xf   : > { %3189 = sst [smem:[#allocation18_spill]] %s1975_s22  ;;  %p46_p0 = scmp.ge.s32.totalorder %s44_s24, 2 }
  0x10   : > { %3190 = sst [smem:[#allocation19_spill]] %s1979_s23  ;;  %p62_p1 = scmp.ne.s32.totalorder %s1967_s20, %s1963_s19 }
  0x11   : > { %p63_p2 = scmp.eq.s32.totalorder %s1979_s23, 0  ;;  %p1651_p3 = scmp.ge.s32.totalorder %s1979_s23, 2 }
  0x12   : > { %s3215_s24 = smov (%p46_p0, %s44_s24), 0  ;;  %p1709_p5 = scmp.lt.s32.totalorder %s1979_s23, 2 }
  0x13   : > { %3191 = sst [smem:[#allocation20_spill]] %s3215_s24  ;;  %p64_p4 = por %p63_p2, %p62_p1 }
  0x14   : > { %s48_s26 = ssub.s32 %s1975_s22, %s3215_s24  ;;  %s2063_s27 = sand.u32 1, %s1967_s20  }
  0x15   : > { %p53_p6 = scmp.eq.s32.totalorder %s48_s26, 0  ;;  %s2066_s28 = sshll.u32 %s1975_s22, 8 }
  0x16   : > { %p2068_p7 = pnand %p1709_p5, %p64_p4  ;;  %s298_s6 = sand.u32 1, %s1979_s23  }
  0x17   : > { %s2073_s30 = scalar_select %p53_p6, %s1967_s20, %s55_s25  }
  0x18   : > { %s1655_s7 = sshll.u32 %s2063_s27, 4  ;;  %s3194_s1 = sld [smem:[#allocation24_spill]] }
  0x19   : > { %3193 = sst [smem:[#allocation21_spill]] %s2073_s30  ;;  %s302_s11 = scalar_lea.vmem [#allocation6], %s1655_s7 }
  0x1a   : > { %s317_s12 = sshll.u32 %s302_s11, 4  ;;  %s2081_s14 = scalar_lea.sflag [#allocation7], %s298_s6  ;;  %s318_s12 = int_to_ptr.vmem [resolvable:$true] %s317_s12 }
  0x1b   : > { %s3173_s15 = smov 128   ;;  %s3175_s16 = smov 8  }
  0x1c   : > { %s2089_s17 = scalar_lea.vmem [#allocation8], %s1655_s7  ;;  %s2093_s26 = sadd.s32 4294967295, %s1979_s23  }
  0x1d   : > { %s1647_s6 = sadd.s32 4294967294, %s1979_s23   ;;  %p68_p8 = scmp.ne.s32.totalorder %s1963_s19, %s1959_s18 }
  0x1e   : > { %s314_s10 = scalar_lea.hbm %s3194_s1, %s2066_s28  ;;  %p69_p9 = scmp.eq.s32.totalorder %s2093_s26, 0 }
  0x1f   : > { %s315_s13 = sshll.u32 %s314_s10, 4  ;;  %p224_p10 = scmp.eq.s32.totalorder %s2093_s26, 1  ;;  %s316_s13 = int_to_ptr.hbm [resolvable:$true] %s315_s13 }
  0x20   : > { %1700 = dma.hbm_to_vmem [thread:$0]  (!%p2068_p7), %s316_s13, 256, %s318_s12, %s2081_s14, %s3173_s15, %s3173_s15, %s3175_s16  }
  0x21   : > { %p230_p11 = scmp.eq.s32.totalorder %s1647_s6, 1  ;;  %p2102_p12 = por %p69_p9, %p68_p8 }
  0x22   : > { %p1648_p13 = scmp.ge.s32.totalorder %s1979_s23, 1  ;;  %p2110_p0 = por %p224_p10, %p62_p1 }
  0x23   : > { %p2114_p2 = por %p230_p11, %p68_p8  ;;  %p237_p4 = scmp.lt.s32.totalorder %s1979_s23, 3 }
  0x24   : > { %s3199_s3 = sld [smem:[#allocation25_spill]]  ;;  %s1983_s6 = smov [#allocation9]  }
  0x25   : > { %s3197_s9 = scalar_select %p2114_p2, 1, 0 }
  0x26   : > { %p2122_p5 = pnand %p1648_p13, %p237_p4  ;;  %s252_s25 = sshll.u32 %s1983_s6, 4  ;;  %s253_s25 = int_to_ptr.vmem [resolvable:$true] %s252_s25 }
  0x27   : > { %3198 = sst [smem:[#allocation22_spill]] %s3197_s9  ;;  %s1652_s15 = sshll.u32 %s2063_s27, 8 }
  0x28   : > { %p1690_p1 = pneg %p2122_p5  ;;  %s3201_s0 = sld [smem:[#allocation23_spill]] }
  0x29   : > { %s1985_s24 = smov 4   ;;  %s276_s6 = scalar_lea.vmem [#allocation3], %s1652_s15 }
  0x2a   : > { %s250_s12 = sshll.u32 %s3199_s3, 4  ;;  %p1691_p6 = pnand %p1690_p1, %p69_p9  ;;  %s251_s12 = int_to_ptr.hbm [resolvable:$true] %s250_s12 }
  0x2b   : > { %s1984_s3 = smov 64   ;;  %s288_s22 = sshll.u32 %s276_s6, 4  ;;  %s289_s22 = int_to_ptr.vmem [resolvable:$true] %s288_s22 }
  0x2c   : > { %1693 = dma.hbm_to_vmem [thread:$0]  (!%p1691_p6), %s251_s12, 192, %s253_s25, [#allocation10], %s1984_s3, %s1984_s3, %s1985_s24  }
  0x2d   : > { %s1675_s30 = sadd.s32 240, %s2066_s28  ;;  %s273_s20 = scalar_lea.sflag [#allocation4], %s2063_s27 }
  0x2e   : > { %s285_s16 = scalar_lea.hbm %s3201_s0, %s2066_s28  ;;  %s3202_s23 = smov 8  }
  0x2f   : > { %s286_s1 = sshll.u32 %s285_s16, 4  ;;  %s3203_s9 = smov 128   ;;  %s287_s1 = int_to_ptr.hbm [resolvable:$true] %s286_s1 }
  0x30   : > { %1697 = dma.hbm_to_vmem [thread:$0]  (!%p2068_p7), %s287_s1, 4096, %s289_s22, %s273_s20, %s3203_s9, %s3203_s9, %s3202_s23  }
  0x31   : > { %s3204_s18 = sshll.u32 %s2089_s17, 4  ;;  %s343_s16 = scalar_lea.hbm %s3169_s2, %s1675_s30  ;;  %s347_s18 = int_to_ptr.vmem [resolvable:$true] %s3204_s18 }
  0x32   : > { %s344_s0 = sshll.u32 %s343_s16, 4  ;;  %358 = sbr.rel (%p2122_p5) target bundleno = 260 (0x104), region = 40  ;;  %s345_s0 = int_to_ptr.hbm [resolvable:$true] %s344_s0 }
  0x33   : > { %1703 = dma.hbm_to_vmem [thread:$0]  (!%p2068_p7), %s345_s0, 256, %s347_s18, %s2081_s14, %s3203_s9, %s3203_s9, %s3202_s23  }
  0x34   : > { %s2156_s3 = sand.u32 (!%p2122_p5), 1, %s1963_s19  }
  0x35   : > { %s1662_s1 = sshll.u32 (!%p2122_p5), %s2156_s3, 8  ;;  %s361_s20 = scalar_lea.sflag (!%p2122_p5), [#allocation4], %s2156_s3 }
  0x36   : > { %s2162_s22 = scalar_lea.vmem (!%p2122_p5), [#allocation3], %s1662_s1 }
  0x37   : > { %1942 = dma.done.wait (%p2102_p12), %s361_s20, 4096  }
  0x38   : > { %1944 = vsyncadd (%p2102_p12), %s361_s20, 4294963200  ;;  %s370_s0 = sand.u32 1, %s2093_s26  }
  0x39   : > { %s371_s18 = scalar_lea.sflag [#allocation7], %s370_s0 }
  0x3a   : > { %1946 = dma.done.wait (%p2102_p12), %s371_s18, 512  }
  0x3b   : > { %1948 = vsyncadd (%p2102_p12), %s371_s18, 4294966784 }
  0x3c   : > { %1950 = dma.done.wait (%p69_p9), [#allocation10], 192  }
  0x3d   : > { %1952 = vsyncadd (%p69_p9), [#allocation10], 4294967104  ;;  %v1154_v0 = vlaneseq  ;;  %v2180_v2 = vld [vmem:[%s2162_s22] sm:$0xff]  ;;  %v2183_v3 = vld [vmem:[%s2162_s22 + $0x8] sm:$0xff]  ;;  %s2296_s27 = scalar_lea.vmem [#allocation11], %s1662_s1  ;;  %s1676_s30 = sshll.u32 %s1971_s21, 8 }
  0x3e   : > { %v626_v4 = vld [vmem:[#allocation9] sm:$0x7]  ;;  %v627_v5 = vld [vmem:[#allocation9 + $0x4] sm:$0x7]  ;;  %v628_v7 = vld [vmem:[#allocation9 + $0x8] sm:$0x7]  ;;  %s1475_s17 = scalar_lea.hbm %s3172_s5, %s1676_s30 }
  0x3f   : > { %v2177_v1 = vshrl.u32 %v1154_v0, 7  ;;  %v2189_v8 = vperm.slane %v626_v4, 0  ;;  %v2191_v9 = vperm.slane %v627_v5, 0  ;;  %v2194_v10 = vperm.slane %v628_v7, 0  ;;  %v2203_v14 = vld [vmem:[%s2162_s22 + $0x10] sm:$0xff]  ;;  %v2206_v15 = vld [vmem:[%s2162_s22 + $0x18] sm:$0xff] }
  0x40   : > { %v2196_v11 = vperm.slane %v626_v4, 1  ;;  %v2198_v12 = vperm.slane %v627_v5, 1  ;;  %v2200_v13 = vperm.slane %v628_v7, 1  ;;  %v2213_v19 = vperm.slane %v626_v4, 2  ;;  %v2229_v29 = vld [vmem:[%s3171_s4] ss:$0 sm:$0xff] }
  0x41   : > { %vm1193_vm0 = vcmp.lt.s32.totalorder %v2177_v1, 1  ;;  %v2187_v6 = vadd.s32 8, %v2177_v1  ;;  %vm1157_vm1 = vcmp.ge.s32.totalorder %v2177_v1, 1  ;;  %v631_v16 = vmul.f32 0.0, %v2189_v8  ;;  %v2262_v56 = vld [vmem:[%s2162_s22 + $0x20] sm:$0xff]  ;;  %v2268_v60 = vld [vmem:[%s2162_s22 + $0x28] sm:$0xff] }
  0x42   : > { %v664_v17 = vmul.f32 %v2191_v9, %v2180_v2  ;;  %v665_v18 = vmul.f32 %v2191_v9, %v2183_v3  ;;  %v729_v20 = vmul.f32 %v2194_v10, %v2203_v14  ;;  %v730_v21 = vmul.f32 %v2194_v10, %v2206_v15  ;;  %s1476_s21 = sshll.u32 %s2296_s27, 4  ;;  %s1478_s25 = sshll.u32 %s1475_s17, 4  ;;  %s1477_s21 = int_to_ptr.vmem [resolvable:$true] %s1476_s21  ;;  %s1479_s25 = int_to_ptr.hbm [resolvable:$true] %s1478_s25 }
  0x43   : > { %v794_v22 = vmul.f32 0.0, %v2196_v11  ;;  %v827_v23 = vmul.f32 %v2198_v12, %v2180_v2  ;;  %v892_v26 = vmul.f32 %v2200_v13, %v2203_v14  ;;  %v992_v27 = vmul.f32 0.0, %v2213_v19  ;;  %s1460_s26 = scalar_lea.sflag [#allocation5], %s2156_s3  ;;  %s1903_s8 = sshra.s32 %s1479_s25, 4  ;;  %s1904_s8 = int_to_ptr.hbm [resolvable:$true] %s1903_s8 }
  0x44   : > { %v696_v24 = vadd.f32 %v664_v17, %v631_v16  ;;  %v697_v25 = vadd.f32 %v665_v18, %v631_v16  ;;  %vm1294_vm2 = vcmp.lt.s32.totalorder %v2177_v1, 7  ;;  %v2231_v30 = vperm.slane %v627_v5, 2  ;;  %s1905_s9 = scalar_lea.hbm %s1904_s8, 256  ;;  %s1909_s6 = scalar_lea.hbm %s3172_s5, 512 }
  0x45   : > { %v859_v28 = vadd.f32 %v827_v23, %v794_v22  ;;  %v2233_v31 = vperm.slane %v628_v7, 2  ;;  %v828_v32 = vmul.f32 %v2198_v12, %v2183_v3  ;;  %vm1160_vm3 = vcmp.lt.s32.totalorder %v2187_v6, 15  ;;  %p1906_p7 = scmp.ne.s32.totalorder %s1904_s8, %s1905_s9  ;;  %p1910_p10 = scmp.lt.s32.totalorder %s1904_s8, %s3172_s5 }
  0x46   : > { %v761_v33 = vadd.f32 %v729_v20, %v696_v24  ;;  %v762_v34 = vadd.f32 %v730_v21, %v697_v25  ;;  %v893_v35 = vmul.f32 %v2200_v13, %v2206_v15  ;;  %v633_v36 = vmul.f32 %v2189_v8, %v2180_v2  ;;  %p1911_p11 = scmp.lt.s32.totalorder %s1909_s6, %s1905_s9 }
  0x47   : > { %v924_v37 = vadd.f32 %v892_v26, %v859_v28  ;;  %v1025_v38 = vmul.f32 %v2231_v30, %v2180_v2  ;;  %v1026_v39 = vmul.f32 %v2231_v30, %v2183_v3  ;;  %v1090_v40 = vmul.f32 %v2233_v31, %v2203_v14  ;;  %p1907_p8 = pnand %p1906_p7, %p2110_p0 }
  0x48   : > { %v1091_v41 = vmul.f32 %v2233_v31, %v2206_v15  ;;  %v1161_v42 = vrot.slane %v761_v33, 7  ;;  %v1177_v43 = vrot.slane %v762_v34, 7  ;;  %v860_v44 = vadd.f32 %v828_v32, %v794_v22  ;;  %p1912_p12 = por %p1911_p11, %p1910_p10 }
  0x49   : > { %v959_v45 = vadd.f32 %v2229_v29, %v924_v37  ;;  %v1057_v46 = vadd.f32 %v1025_v38, %v992_v27  ;;  %v1058_v47 = vadd.f32 %v1026_v39, %v992_v27  ;;  %v634_v48 = vmul.f32 %v2189_v8, %v2183_v3  ;;  %p1908_p9 = pneg %p1907_p8 }
  0x4a   : > { %v1210_v49 = vsel %vm1193_vm0, %v1177_v43, %v1161_v42  ;;  %v925_v50 = vadd.f32 %v893_v35, %v860_v44  ;;  %v1194_v51 = vsel %vm1193_vm0, %v1161_v42, %v1177_v43  ;;  %v666_v52 = vmul.f32 %v2191_v9, %v2203_v14 }
  0x4b   : > { %v1122_v53 = vadd.f32 %v1090_v40, %v1057_v46  ;;  %v1123_v54 = vadd.f32 %v1091_v41, %v1058_v47  ;;  %v1230_v55 = vsel %vm1157_vm1, %v1210_v49, 0.0  ;;  %v667_v57 = vmul.f32 %v2191_v9, %v2206_v15  ;;  %p1913_p13 = pnand %p1912_p12, %p1908_p9 }
  0x4c   : > { %v1363_v58 = vadd.f32 %v1230_v55, %v959_v45  ;;  %v960_v59 = vadd.f32 %v2229_v29, %v925_v50  ;;  %v698_v61 = vadd.f32 %v666_v52, %v633_v36  ;;  %v731_v62 = vmul.f32 %v2194_v10, %v2262_v56 }
  0x4d   : > { %v1262_v63 = vrot.slane %v1122_v53, 1  ;;  %v1278_v0 = vrot.slane %v1123_v54, 1  ;;  %v699_v4 = vadd.f32 %v667_v57, %v634_v48  ;;  %v732_v5 = vmul.f32 %v2194_v10, %v2268_v60  ;;  %v2324_v57 = vld [vmem:[%s2162_s22 + $0x30] sm:$0xff] }
  0x4e   : > { %v1364_v7 = vadd.f32 %v1194_v51, %v960_v59  ;;  %v763_v16 = vadd.f32 %v731_v62, %v698_v61  ;;  %v796_v17 = vmul.f32 %v2196_v11, %v2180_v2  ;;  %v829_v18 = vmul.f32 %v2198_v12, %v2203_v14 }
  0x4f   : > { %v1295_v20 = vsel %vm1294_vm2, %v1262_v63, %v1278_v0  ;;  %v1311_v21 = vsel %vm1294_vm2, %v1278_v0, %v1262_v63  ;;  %v764_v22 = vadd.f32 %v732_v5, %v699_v4  ;;  %v894_v23 = vmul.f32 %v2200_v13, %v2262_v56 }
  0x50   : > { %v1395_v24 = vadd.f32 %v1363_v58, %v1295_v20  ;;  %v1332_v25 = vsel %vm1160_vm3, %v1311_v21, 0.0  ;;  %v861_v26 = vadd.f32 %v829_v18, %v796_v17  ;;  %v994_v27 = vmul.f32 %v2213_v19, %v2180_v2  ;;  %v2327_v58 = vld [vmem:[%s2162_s22 + $0x38] sm:$0xff] }
  0x51   : > { %v1396_v28 = vadd.f32 %v1364_v7, %v1332_v25  ;;  %v995_v32 = vmul.f32 %v2213_v19, %v2183_v3  ;;  %v1027_v33 = vmul.f32 %v2231_v30, %v2203_v14  ;;  %v1028_v34 = vmul.f32 %v2231_v30, %v2206_v15 }
  0x52   : > { %1427 = vst [vmem:[%s2296_s27] sm:$0xff] %v1395_v24  ;;  %v926_v35 = vadd.f32 %v894_v23, %v861_v26  ;;  %v1092_v2 = vmul.f32 %v2233_v31, %v2262_v56  ;;  %v1093_v36 = vmul.f32 %v2233_v31, %v2268_v60  ;;  %v1162_v37 = vrot.slane %v763_v16, 7 }
  0x53   : > { %1428 = vst [vmem:[%s2296_s27 + $0x8] sm:$0xff] %v1396_v28  ;;  %v1059_v38 = vadd.f32 %v1027_v33, %v994_v27  ;;  %v1060_v39 = vadd.f32 %v1028_v34, %v995_v32  ;;  %v1178_v40 = vrot.slane %v764_v22, 7  ;;  %v797_v41 = vmul.f32 %v2196_v11, %v2183_v3 }
  0x54   : > { %v961_v42 = vadd.f32 %v2229_v29, %v926_v35  ;;  %v830_v43 = vmul.f32 %v2198_v12, %v2206_v15  ;;  %v895_v44 = vmul.f32 %v2200_v13, %v2268_v60  ;;  %v635_v45 = vmul.f32 %v2189_v8, %v2203_v14 }
  0x55   : > { %v1124_v46 = vadd.f32 %v1092_v2, %v1059_v38  ;;  %v1125_v47 = vadd.f32 %v1093_v36, %v1060_v39  ;;  %v1211_v48 = vsel %vm1193_vm0, %v1178_v40, %v1162_v37  ;;  %v1195_v3 = vsel %vm1193_vm0, %v1162_v37, %v1178_v40 }
  0x56   : > { %v1232_v49 = vsel %vm1157_vm1, %v1211_v48, 0.0  ;;  %v862_v50 = vadd.f32 %v830_v43, %v797_v41  ;;  %v636_v51 = vmul.f32 %v2189_v8, %v2206_v15  ;;  %v668_v52 = vmul.f32 %v2191_v9, %v2262_v56 }
  0x57   : > { %v1263_v53 = vrot.slane %v1124_v46, 1  ;;  %v1279_v54 = vrot.slane %v1125_v47, 1  ;;  %v1365_v55 = vadd.f32 %v1232_v49, %v961_v42  ;;  %v669_v59 = vmul.f32 %v2191_v9, %v2268_v60 }
  0x58   : > { %v927_v61 = vadd.f32 %v895_v44, %v862_v50  ;;  %v700_v62 = vadd.f32 %v668_v52, %v635_v45  ;;  %v733_v63 = vmul.f32 %v2194_v10, %v2324_v57  ;;  %v734_v0 = vmul.f32 %v2194_v10, %v2327_v58 }
  0x59   : > { %v1296_v4 = vsel %vm1294_vm2, %v1263_v53, %v1279_v54  ;;  %v1312_v5 = vsel %vm1294_vm2, %v1279_v54, %v1263_v53  ;;  %v701_v7 = vadd.f32 %v669_v59, %v636_v51  ;;  %v798_v16 = vmul.f32 %v2196_v11, %v2203_v14  ;;  %v2378_v51 = vld [vmem:[%s2162_s22 + $0x40] sm:$0xff]  ;;  %v2385_v59 = vld [vmem:[%s2162_s22 + $0x48] sm:$0xff] }
  0x5a   : > { %v1397_v17 = vadd.f32 %v1365_v55, %v1296_v4  ;;  %v962_v18 = vadd.f32 %v2229_v29, %v927_v61  ;;  %v1334_v20 = vsel %vm1160_vm3, %v1312_v5, 0.0  ;;  %v765_v21 = vadd.f32 %v733_v63, %v700_v62 }
  0x5b   : > { %v766_v22 = vadd.f32 %v734_v0, %v701_v7  ;;  %v831_v23 = vmul.f32 %v2198_v12, %v2262_v56  ;;  %v896_v24 = vmul.f32 %v2200_v13, %v2324_v57  ;;  %v996_v25 = vmul.f32 %v2213_v19, %v2203_v14 }
  0x5c   : > { %1429 = vst [vmem:[%s2296_s27 + $0x10] sm:$0xff] %v1397_v17  ;;  %v1366_v26 = vadd.f32 %v1195_v3, %v962_v18  ;;  %v997_v27 = vmul.f32 %v2213_v19, %v2206_v15  ;;  %v1029_v28 = vmul.f32 %v2231_v30, %v2262_v56  ;;  %v1030_v32 = vmul.f32 %v2231_v30, %v2268_v60 }
  0x5d   : > { %v863_v33 = vadd.f32 %v831_v23, %v798_v16  ;;  %v1094_v34 = vmul.f32 %v2233_v31, %v2324_v57  ;;  %v1095_v35 = vmul.f32 %v2233_v31, %v2327_v58  ;;  %v1163_v14 = vrot.slane %v765_v21, 7 }
  0x5e   : > { %v1398_v2 = vadd.f32 %v1366_v26, %v1334_v20  ;;  %v1061_v36 = vadd.f32 %v1029_v28, %v996_v25  ;;  %v1062_v37 = vadd.f32 %v1030_v32, %v997_v27  ;;  %v1179_v38 = vrot.slane %v766_v22, 7 }
  0x5f   : > { %v928_v39 = vadd.f32 %v896_v24, %v863_v33  ;;  %v799_v40 = vmul.f32 %v2196_v11, %v2206_v15  ;;  %v832_v41 = vmul.f32 %v2198_v12, %v2268_v60  ;;  %v897_v42 = vmul.f32 %v2200_v13, %v2327_v58 }
  0x60   : > { %1430 = vst [vmem:[%s2296_s27 + $0x18] sm:$0xff] %v1398_v2  ;;  %v1126_v43 = vadd.f32 %v1094_v34, %v1061_v36  ;;  %v1127_v44 = vadd.f32 %v1095_v35, %v1062_v37  ;;  %v1212_v45 = vsel %vm1193_vm0, %v1179_v38, %v1163_v14  ;;  %v1196_v46 = vsel %vm1193_vm0, %v1163_v14, %v1179_v38 }
  0x61   : > { %v963_v47 = vadd.f32 %v2229_v29, %v928_v39  ;;  %v1234_v15 = vsel %vm1157_vm1, %v1212_v45, 0.0  ;;  %v864_v48 = vadd.f32 %v832_v41, %v799_v40  ;;  %v637_v3 = vmul.f32 %v2189_v8, %v2262_v56 }
  0x62   : > { %v1264_v49 = vrot.slane %v1126_v43, 1  ;;  %v1280_v50 = vrot.slane %v1127_v44, 1  ;;  %v638_v52 = vmul.f32 %v2189_v8, %v2268_v60  ;;  %v670_v53 = vmul.f32 %v2191_v9, %v2324_v57 }
  0x63   : > { %v1367_v54 = vadd.f32 %v1234_v15, %v963_v47  ;;  %v929_v55 = vadd.f32 %v897_v42, %v864_v48  ;;  %v671_v61 = vmul.f32 %v2191_v9, %v2327_v58  ;;  %v735_v62 = vmul.f32 %v2194_v10, %v2378_v51 }
  0x64   : > { %v1297_v63 = vsel %vm1294_vm2, %v1264_v49, %v1280_v50  ;;  %v1313_v0 = vsel %vm1294_vm2, %v1280_v50, %v1264_v49  ;;  %v702_v4 = vadd.f32 %v670_v53, %v637_v3  ;;  %v736_v5 = vmul.f32 %v2194_v10, %v2385_v59  ;;  %v2440_v53 = vld [vmem:[%s2162_s22 + $0x50] sm:$0xff] }
  0x65   : > { %v1399_v7 = vadd.f32 %v1367_v54, %v1297_v63  ;;  %v964_v16 = vadd.f32 %v2229_v29, %v929_v55  ;;  %v1336_v17 = vsel %vm1160_vm3, %v1313_v0, 0.0  ;;  %v703_v18 = vadd.f32 %v671_v61, %v638_v52  ;;  %v2443_v54 = vld [vmem:[%s2162_s22 + $0x58] sm:$0xff] }
  0x66   : > { %v767_v20 = vadd.f32 %v735_v62, %v702_v4  ;;  %v800_v21 = vmul.f32 %v2196_v11, %v2262_v56  ;;  %v833_v22 = vmul.f32 %v2198_v12, %v2324_v57  ;;  %v898_v23 = vmul.f32 %v2200_v13, %v2378_v51 }
  0x67   : > { %1431 = vst [vmem:[%s2296_s27 + $0x20] sm:$0xff] %v1399_v7  ;;  %v1368_v24 = vadd.f32 %v1196_v46, %v964_v16  ;;  %v768_v25 = vadd.f32 %v736_v5, %v703_v18  ;;  %v998_v26 = vmul.f32 %v2213_v19, %v2262_v56  ;;  %v999_v27 = vmul.f32 %v2213_v19, %v2268_v60 }
  0x68   : > { %v865_v28 = vadd.f32 %v833_v22, %v800_v21  ;;  %v1031_v32 = vmul.f32 %v2231_v30, %v2324_v57  ;;  %v1032_v33 = vmul.f32 %v2231_v30, %v2327_v58  ;;  %v1096_v34 = vmul.f32 %v2233_v31, %v2378_v51 }
  0x69   : > { %v1400_v35 = vadd.f32 %v1368_v24, %v1336_v17  ;;  %v1097_v14 = vmul.f32 %v2233_v31, %v2385_v59  ;;  %v1164_v2 = vrot.slane %v767_v20, 7  ;;  %v1180_v36 = vrot.slane %v768_v25, 7 }
  0x6a   : > { %v930_v56 = vadd.f32 %v898_v23, %v865_v28  ;;  %v1063_v37 = vadd.f32 %v1031_v32, %v998_v26  ;;  %v1064_v38 = vadd.f32 %v1032_v33, %v999_v27  ;;  %v801_v39 = vmul.f32 %v2196_v11, %v2268_v60 }
  0x6b   : > { %1432 = vst [vmem:[%s2296_s27 + $0x28] sm:$0xff] %v1400_v35  ;;  %v1213_v40 = vsel %vm1193_vm0, %v1180_v36, %v1164_v2  ;;  %v834_v41 = vmul.f32 %v2198_v12, %v2327_v58  ;;  %v899_v42 = vmul.f32 %v2200_v13, %v2385_v59  ;;  %v1197_v43 = vsel %vm1193_vm0, %v1164_v2, %v1180_v36 }
  0x6c   : > { %v965_v44 = vadd.f32 %v2229_v29, %v930_v56  ;;  %v1128_v45 = vadd.f32 %v1096_v34, %v1063_v37  ;;  %v1129_v46 = vadd.f32 %v1097_v14, %v1064_v38  ;;  %v1236_v60 = vsel %vm1157_vm1, %v1213_v40, 0.0 }
  0x6d   : > { %v866_v47 = vadd.f32 %v834_v41, %v801_v39  ;;  %v639_v15 = vmul.f32 %v2189_v8, %v2324_v57  ;;  %v640_v48 = vmul.f32 %v2189_v8, %v2327_v58  ;;  %v672_v3 = vmul.f32 %v2191_v9, %v2378_v51 }
  0x6e   : > { %v1265_v49 = vrot.slane %v1128_v45, 1  ;;  %v1281_v50 = vrot.slane %v1129_v46, 1  ;;  %v1369_v52 = vadd.f32 %v1236_v60, %v965_v44  ;;  %v673_v55 = vmul.f32 %v2191_v9, %v2385_v59 }
  0x6f   : > { %v931_v61 = vadd.f32 %v899_v42, %v866_v47  ;;  %v704_v62 = vadd.f32 %v672_v3, %v639_v15  ;;  %v737_v63 = vmul.f32 %v2194_v10, %v2440_v53  ;;  %v738_v0 = vmul.f32 %v2194_v10, %v2443_v54 }
  0x70   : > { %v1298_v4 = vsel %vm1294_vm2, %v1265_v49, %v1281_v50  ;;  %v1314_v5 = vsel %vm1294_vm2, %v1281_v50, %v1265_v49  ;;  %v705_v7 = vadd.f32 %v673_v55, %v640_v48  ;;  %v802_v16 = vmul.f32 %v2196_v11, %v2324_v57  ;;  %v2494_v48 = vld [vmem:[%s2162_s22 + $0x60] sm:$0xff]  ;;  %v2501_v55 = vld [vmem:[%s2162_s22 + $0x68] sm:$0xff] }
  0x71   : > { %v1401_v17 = vadd.f32 %v1369_v52, %v1298_v4  ;;  %v966_v18 = vadd.f32 %v2229_v29, %v931_v61  ;;  %v1338_v20 = vsel %vm1160_vm3, %v1314_v5, 0.0  ;;  %v769_v21 = vadd.f32 %v737_v63, %v704_v62 }
  0x72   : > { %v770_v22 = vadd.f32 %v738_v0, %v705_v7  ;;  %v835_v23 = vmul.f32 %v2198_v12, %v2378_v51  ;;  %v900_v24 = vmul.f32 %v2200_v13, %v2440_v53  ;;  %v1000_v25 = vmul.f32 %v2213_v19, %v2324_v57 }
  0x73   : > { %1433 = vst [vmem:[%s2296_s27 + $0x30] sm:$0xff] %v1401_v17  ;;  %v1370_v26 = vadd.f32 %v1197_v43, %v966_v18  ;;  %v1001_v27 = vmul.f32 %v2213_v19, %v2327_v58  ;;  %v1033_v28 = vmul.f32 %v2231_v30, %v2378_v51  ;;  %v1034_v32 = vmul.f32 %v2231_v30, %v2385_v59 }
  0x74   : > { %v867_v33 = vadd.f32 %v835_v23, %v802_v16  ;;  %v1098_v34 = vmul.f32 %v2233_v31, %v2440_v53  ;;  %v1099_v35 = vmul.f32 %v2233_v31, %v2443_v54  ;;  %v1165_v57 = vrot.slane %v769_v21, 7 }
  0x75   : > { %v1402_v14 = vadd.f32 %v1370_v26, %v1338_v20  ;;  %v1065_v2 = vadd.f32 %v1033_v28, %v1000_v25  ;;  %v1066_v36 = vadd.f32 %v1034_v32, %v1001_v27  ;;  %v1181_v56 = vrot.slane %v770_v22, 7 }
  0x76   : > { %v932_v37 = vadd.f32 %v900_v24, %v867_v33  ;;  %v803_v38 = vmul.f32 %v2196_v11, %v2327_v58  ;;  %v836_v39 = vmul.f32 %v2198_v12, %v2385_v59  ;;  %v901_v40 = vmul.f32 %v2200_v13, %v2443_v54 }
  0x77   : > { %1434 = vst [vmem:[%s2296_s27 + $0x38] sm:$0xff] %v1402_v14  ;;  %v1130_v41 = vadd.f32 %v1098_v34, %v1065_v2  ;;  %v1131_v42 = vadd.f32 %v1099_v35, %v1066_v36  ;;  %v1214_v43 = vsel %vm1193_vm0, %v1181_v56, %v1165_v57  ;;  %v1198_v44 = vsel %vm1193_vm0, %v1165_v57, %v1181_v56 }
  0x78   : > { %v967_v45 = vadd.f32 %v2229_v29, %v932_v37  ;;  %v1238_v58 = vsel %vm1157_vm1, %v1214_v43, 0.0  ;;  %v868_v46 = vadd.f32 %v836_v39, %v803_v38  ;;  %v641_v60 = vmul.f32 %v2189_v8, %v2378_v51 }
  0x79   : > { %v1266_v47 = vrot.slane %v1130_v41, 1  ;;  %v1282_v15 = vrot.slane %v1131_v42, 1  ;;  %v642_v3 = vmul.f32 %v2189_v8, %v2385_v59  ;;  %v674_v49 = vmul.f32 %v2191_v9, %v2440_v53 }
  0x7a   : > { %v1371_v50 = vadd.f32 %v1238_v58, %v967_v45  ;;  %v933_v52 = vadd.f32 %v901_v40, %v868_v46  ;;  %v675_v61 = vmul.f32 %v2191_v9, %v2443_v54  ;;  %v739_v62 = vmul.f32 %v2194_v10, %v2494_v48 }
  0x7b   : > { %v1299_v63 = vsel %vm1294_vm2, %v1266_v47, %v1282_v15  ;;  %v1315_v0 = vsel %vm1294_vm2, %v1282_v15, %v1266_v47  ;;  %v706_v4 = vadd.f32 %v674_v49, %v641_v60  ;;  %v740_v5 = vmul.f32 %v2194_v10, %v2501_v55  ;;  %v2556_v49 = vld [vmem:[%s2162_s22 + $0x70] sm:$0xff] }
  0x7c   : > { %v1403_v7 = vadd.f32 %v1371_v50, %v1299_v63  ;;  %v968_v16 = vadd.f32 %v2229_v29, %v933_v52  ;;  %v1340_v17 = vsel %vm1160_vm3, %v1315_v0, 0.0  ;;  %v707_v18 = vadd.f32 %v675_v61, %v642_v3  ;;  %v2559_v50 = vld [vmem:[%s2162_s22 + $0x78] sm:$0xff] }
  0x7d   : > { %v771_v20 = vadd.f32 %v739_v62, %v706_v4  ;;  %v804_v21 = vmul.f32 %v2196_v11, %v2378_v51  ;;  %v837_v22 = vmul.f32 %v2198_v12, %v2440_v53  ;;  %v902_v23 = vmul.f32 %v2200_v13, %v2494_v48 }
  0x7e   : > { %1435 = vst [vmem:[%s2296_s27 + $0x40] sm:$0xff] %v1403_v7  ;;  %v1372_v24 = vadd.f32 %v1198_v44, %v968_v16  ;;  %v772_v25 = vadd.f32 %v740_v5, %v707_v18  ;;  %v1002_v26 = vmul.f32 %v2213_v19, %v2378_v51  ;;  %v1003_v27 = vmul.f32 %v2213_v19, %v2385_v59 }
  0x7f   : > { %v869_v28 = vadd.f32 %v837_v22, %v804_v21  ;;  %v1035_v32 = vmul.f32 %v2231_v30, %v2440_v53  ;;  %v1036_v33 = vmul.f32 %v2231_v30, %v2443_v54  ;;  %v1100_v34 = vmul.f32 %v2233_v31, %v2494_v48 }
  0x80   : > { %v1404_v35 = vadd.f32 %v1372_v24, %v1340_v17  ;;  %v1101_v57 = vmul.f32 %v2233_v31, %v2501_v55  ;;  %v1166_v14 = vrot.slane %v771_v20, 7  ;;  %v1182_v2 = vrot.slane %v772_v25, 7 }
  0x81   : > { %v934_v51 = vadd.f32 %v902_v23, %v869_v28  ;;  %v1067_v36 = vadd.f32 %v1035_v32, %v1002_v26  ;;  %v1068_v56 = vadd.f32 %v1036_v33, %v1003_v27  ;;  %v805_v37 = vmul.f32 %v2196_v11, %v2385_v59 }
  0x82   : > { %1436 = vst [vmem:[%s2296_s27 + $0x48] sm:$0xff] %v1404_v35  ;;  %v1215_v38 = vsel %vm1193_vm0, %v1182_v2, %v1166_v14  ;;  %v838_v39 = vmul.f32 %v2198_v12, %v2443_v54  ;;  %v903_v40 = vmul.f32 %v2200_v13, %v2501_v55  ;;  %v1199_v41 = vsel %vm1193_vm0, %v1166_v14, %v1182_v2 }
  0x83   : > { %v969_v42 = vadd.f32 %v2229_v29, %v934_v51  ;;  %v1132_v43 = vadd.f32 %v1100_v34, %v1067_v36  ;;  %v1133_v44 = vadd.f32 %v1101_v57, %v1068_v56  ;;  %v1240_v59 = vsel %vm1157_vm1, %v1215_v38, 0.0 }
  0x84   : > { %v870_v45 = vadd.f32 %v838_v39, %v805_v37  ;;  %v643_v58 = vmul.f32 %v2189_v8, %v2440_v53  ;;  %v644_v46 = vmul.f32 %v2189_v8, %v2443_v54  ;;  %v676_v60 = vmul.f32 %v2191_v9, %v2494_v48 }
  0x85   : > { %v1267_v47 = vrot.slane %v1132_v43, 1  ;;  %v1283_v15 = vrot.slane %v1133_v44, 1  ;;  %v1373_v3 = vadd.f32 %v1240_v59, %v969_v42  ;;  %v677_v52 = vmul.f32 %v2191_v9, %v2501_v55 }
  0x86   : > { %v935_v61 = vadd.f32 %v903_v40, %v870_v45  ;;  %v708_v62 = vadd.f32 %v676_v60, %v643_v58  ;;  %v741_v63 = vmul.f32 %v2194_v10, %v2556_v49  ;;  %v742_v0 = vmul.f32 %v2194_v10, %v2559_v50 }
  0x87   : > { %v1300_v4 = vsel %vm1294_vm2, %v1267_v47, %v1283_v15  ;;  %v1316_v5 = vsel %vm1294_vm2, %v1283_v15, %v1267_v47  ;;  %v709_v7 = vadd.f32 %v677_v52, %v644_v46  ;;  %v806_v16 = vmul.f32 %v2196_v11, %v2440_v53  ;;  %v2610_v46 = vld [vmem:[%s2162_s22 + $0x80] sm:$0xff]  ;;  %v2617_v52 = vld [vmem:[%s2162_s22 + $0x88] sm:$0xff] }
  0x88   : > { %v1405_v17 = vadd.f32 %v1373_v3, %v1300_v4  ;;  %v970_v18 = vadd.f32 %v2229_v29, %v935_v61  ;;  %v1342_v20 = vsel %vm1160_vm3, %v1316_v5, 0.0  ;;  %v773_v21 = vadd.f32 %v741_v63, %v708_v62 }
  0x89   : > { %v774_v22 = vadd.f32 %v742_v0, %v709_v7  ;;  %v839_v23 = vmul.f32 %v2198_v12, %v2494_v48  ;;  %v904_v24 = vmul.f32 %v2200_v13, %v2556_v49  ;;  %v1004_v25 = vmul.f32 %v2213_v19, %v2440_v53 }
  0x8a   : > { %1437 = vst [vmem:[%s2296_s27 + $0x50] sm:$0xff] %v1405_v17  ;;  %v1374_v26 = vadd.f32 %v1199_v41, %v970_v18  ;;  %v1005_v27 = vmul.f32 %v2213_v19, %v2443_v54  ;;  %v1037_v28 = vmul.f32 %v2231_v30, %v2494_v48  ;;  %v1038_v32 = vmul.f32 %v2231_v30, %v2501_v55 }
  0x8b   : > { %v871_v33 = vadd.f32 %v839_v23, %v806_v16  ;;  %v1102_v34 = vmul.f32 %v2233_v31, %v2556_v49  ;;  %v1103_v35 = vmul.f32 %v2233_v31, %v2559_v50  ;;  %v1167_v53 = vrot.slane %v773_v21, 7 }
  0x8c   : > { %v1406_v57 = vadd.f32 %v1374_v26, %v1342_v20  ;;  %v1069_v14 = vadd.f32 %v1037_v28, %v1004_v25  ;;  %v1070_v2 = vadd.f32 %v1038_v32, %v1005_v27  ;;  %v1183_v51 = vrot.slane %v774_v22, 7 }
  0x8d   : > { %v936_v36 = vadd.f32 %v904_v24, %v871_v33  ;;  %v807_v56 = vmul.f32 %v2196_v11, %v2443_v54  ;;  %v840_v37 = vmul.f32 %v2198_v12, %v2501_v55  ;;  %v905_v38 = vmul.f32 %v2200_v13, %v2559_v50 }
  0x8e   : > { %1438 = vst [vmem:[%s2296_s27 + $0x58] sm:$0xff] %v1406_v57  ;;  %v1134_v39 = vadd.f32 %v1102_v34, %v1069_v14  ;;  %v1135_v40 = vadd.f32 %v1103_v35, %v1070_v2  ;;  %v1216_v41 = vsel %vm1193_vm0, %v1183_v51, %v1167_v53  ;;  %v1200_v42 = vsel %vm1193_vm0, %v1167_v53, %v1183_v51 }
  0x8f   : > { %v971_v43 = vadd.f32 %v2229_v29, %v936_v36  ;;  %v1242_v54 = vsel %vm1157_vm1, %v1216_v41, 0.0  ;;  %v872_v44 = vadd.f32 %v840_v37, %v807_v56  ;;  %v645_v59 = vmul.f32 %v2189_v8, %v2494_v48 }
  0x90   : > { %v1268_v45 = vrot.slane %v1134_v39, 1  ;;  %v1284_v58 = vrot.slane %v1135_v40, 1  ;;  %v646_v60 = vmul.f32 %v2189_v8, %v2501_v55  ;;  %v678_v47 = vmul.f32 %v2191_v9, %v2556_v49 }
  0x91   : > { %v1375_v15 = vadd.f32 %v1242_v54, %v971_v43  ;;  %v937_v3 = vadd.f32 %v905_v38, %v872_v44  ;;  %v679_v61 = vmul.f32 %v2191_v9, %v2559_v50  ;;  %v743_v62 = vmul.f32 %v2194_v10, %v2610_v46 }
  0x92   : > { %v1301_v63 = vsel %vm1294_vm2, %v1268_v45, %v1284_v58  ;;  %v1317_v0 = vsel %vm1294_vm2, %v1284_v58, %v1268_v45  ;;  %v710_v4 = vadd.f32 %v678_v47, %v645_v59  ;;  %v744_v5 = vmul.f32 %v2194_v10, %v2617_v52  ;;  %v2672_v47 = vld [vmem:[%s2162_s22 + $0x90] sm:$0xff] }
  0x93   : > { %v1407_v7 = vadd.f32 %v1375_v15, %v1301_v63  ;;  %v972_v16 = vadd.f32 %v2229_v29, %v937_v3  ;;  %v1344_v17 = vsel %vm1160_vm3, %v1317_v0, 0.0  ;;  %v711_v18 = vadd.f32 %v679_v61, %v646_v60  ;;  %v2675_v15 = vld [vmem:[%s2162_s22 + $0x98] sm:$0xff] }
  0x94   : > { %v775_v20 = vadd.f32 %v743_v62, %v710_v4  ;;  %v808_v21 = vmul.f32 %v2196_v11, %v2494_v48  ;;  %v841_v22 = vmul.f32 %v2198_v12, %v2556_v49  ;;  %v906_v23 = vmul.f32 %v2200_v13, %v2610_v46 }
  0x95   : > { %1439 = vst [vmem:[%s2296_s27 + $0x60] sm:$0xff] %v1407_v7  ;;  %v1376_v24 = vadd.f32 %v1200_v42, %v972_v16  ;;  %v776_v25 = vadd.f32 %v744_v5, %v711_v18  ;;  %v1006_v26 = vmul.f32 %v2213_v19, %v2494_v48  ;;  %v1007_v27 = vmul.f32 %v2213_v19, %v2501_v55 }
  0x96   : > { %v873_v28 = vadd.f32 %v841_v22, %v808_v21  ;;  %v1039_v32 = vmul.f32 %v2231_v30, %v2556_v49  ;;  %v1040_v33 = vmul.f32 %v2231_v30, %v2559_v50  ;;  %v1104_v34 = vmul.f32 %v2233_v31, %v2610_v46 }
  0x97   : > { %v1408_v35 = vadd.f32 %v1376_v24, %v1344_v17  ;;  %v1105_v53 = vmul.f32 %v2233_v31, %v2617_v52  ;;  %v1168_v57 = vrot.slane %v775_v20, 7  ;;  %v1184_v14 = vrot.slane %v776_v25, 7 }
  0x98   : > { %v938_v48 = vadd.f32 %v906_v23, %v873_v28  ;;  %v1071_v2 = vadd.f32 %v1039_v32, %v1006_v26  ;;  %v1072_v51 = vadd.f32 %v1040_v33, %v1007_v27  ;;  %v809_v36 = vmul.f32 %v2196_v11, %v2501_v55 }
  0x99   : > { %1440 = vst [vmem:[%s2296_s27 + $0x68] sm:$0xff] %v1408_v35  ;;  %v1217_v56 = vsel %vm1193_vm0, %v1184_v14, %v1168_v57  ;;  %v842_v37 = vmul.f32 %v2198_v12, %v2559_v50  ;;  %v907_v38 = vmul.f32 %v2200_v13, %v2617_v52  ;;  %v1201_v39 = vsel %vm1193_vm0, %v1168_v57, %v1184_v14 }
  0x9a   : > { %v973_v40 = vadd.f32 %v2229_v29, %v938_v48  ;;  %v1136_v41 = vadd.f32 %v1104_v34, %v1071_v2  ;;  %v1137_v42 = vadd.f32 %v1105_v53, %v1072_v51  ;;  %v1244_v55 = vsel %vm1157_vm1, %v1217_v56, 0.0 }
  0x9b   : > { %v874_v43 = vadd.f32 %v842_v37, %v809_v36  ;;  %v647_v54 = vmul.f32 %v2189_v8, %v2556_v49  ;;  %v648_v44 = vmul.f32 %v2189_v8, %v2559_v50  ;;  %v680_v59 = vmul.f32 %v2191_v9, %v2610_v46 }
  0x9c   : > { %v1269_v45 = vrot.slane %v1136_v41, 1  ;;  %v1285_v58 = vrot.slane %v1137_v42, 1  ;;  %v1377_v60 = vadd.f32 %v1244_v55, %v973_v40  ;;  %v681_v3 = vmul.f32 %v2191_v9, %v2617_v52 }
  0x9d   : > { %v939_v61 = vadd.f32 %v907_v38, %v874_v43  ;;  %v712_v62 = vadd.f32 %v680_v59, %v647_v54  ;;  %v745_v63 = vmul.f32 %v2194_v10, %v2672_v47  ;;  %v746_v0 = vmul.f32 %v2194_v10, %v2675_v15 }
  0x9e   : > { %v1302_v4 = vsel %vm1294_vm2, %v1269_v45, %v1285_v58  ;;  %v1318_v5 = vsel %vm1294_vm2, %v1285_v58, %v1269_v45  ;;  %v713_v7 = vadd.f32 %v681_v3, %v648_v44  ;;  %v810_v16 = vmul.f32 %v2196_v11, %v2556_v49  ;;  %v2726_v44 = vld [vmem:[%s2162_s22 + $0xa0] sm:$0xff]  ;;  %v2733_v3 = vld [vmem:[%s2162_s22 + $0xa8] sm:$0xff] }
  0x9f   : > { %v1409_v17 = vadd.f32 %v1377_v60, %v1302_v4  ;;  %v974_v18 = vadd.f32 %v2229_v29, %v939_v61  ;;  %v1346_v20 = vsel %vm1160_vm3, %v1318_v5, 0.0  ;;  %v777_v21 = vadd.f32 %v745_v63, %v712_v62 }
  0xa0   : > { %v778_v22 = vadd.f32 %v746_v0, %v713_v7  ;;  %v843_v23 = vmul.f32 %v2198_v12, %v2610_v46  ;;  %v908_v24 = vmul.f32 %v2200_v13, %v2672_v47  ;;  %v1008_v25 = vmul.f32 %v2213_v19, %v2556_v49 }
  0xa1   : > { %1441 = vst [vmem:[%s2296_s27 + $0x70] sm:$0xff] %v1409_v17  ;;  %v1378_v26 = vadd.f32 %v1201_v39, %v974_v18  ;;  %v1009_v27 = vmul.f32 %v2213_v19, %v2559_v50  ;;  %v1041_v28 = vmul.f32 %v2231_v30, %v2610_v46  ;;  %v1042_v32 = vmul.f32 %v2231_v30, %v2617_v52 }
  0xa2   : > { %v875_v33 = vadd.f32 %v843_v23, %v810_v16  ;;  %v1106_v34 = vmul.f32 %v2233_v31, %v2672_v47  ;;  %v1107_v35 = vmul.f32 %v2233_v31, %v2675_v15  ;;  %v1169_v49 = vrot.slane %v777_v21, 7 }
  0xa3   : > { %v1410_v53 = vadd.f32 %v1378_v26, %v1346_v20  ;;  %v1073_v57 = vadd.f32 %v1041_v28, %v1008_v25  ;;  %v1074_v14 = vadd.f32 %v1042_v32, %v1009_v27  ;;  %v1185_v48 = vrot.slane %v778_v22, 7 }
  0xa4   : > { %v940_v2 = vadd.f32 %v908_v24, %v875_v33  ;;  %v811_v51 = vmul.f32 %v2196_v11, %v2559_v50  ;;  %v844_v36 = vmul.f32 %v2198_v12, %v2617_v52  ;;  %v909_v56 = vmul.f32 %v2200_v13, %v2675_v15 }
  0xa5   : > { %1442 = vst [vmem:[%s2296_s27 + $0x78] sm:$0xff] %v1410_v53  ;;  %v1138_v37 = vadd.f32 %v1106_v34, %v1073_v57  ;;  %v1139_v38 = vadd.f32 %v1107_v35, %v1074_v14  ;;  %v1218_v39 = vsel %vm1193_vm0, %v1185_v48, %v1169_v49  ;;  %v1202_v40 = vsel %vm1193_vm0, %v1169_v49, %v1185_v48 }
  0xa6   : > { %v975_v41 = vadd.f32 %v2229_v29, %v940_v2  ;;  %v1246_v50 = vsel %vm1157_vm1, %v1218_v39, 0.0  ;;  %v876_v42 = vadd.f32 %v844_v36, %v811_v51  ;;  %v649_v55 = vmul.f32 %v2189_v8, %v2610_v46 }
  0xa7   : > { %v1270_v43 = vrot.slane %v1138_v37, 1  ;;  %v1286_v54 = vrot.slane %v1139_v38, 1  ;;  %v650_v59 = vmul.f32 %v2189_v8, %v2617_v52  ;;  %v682_v45 = vmul.f32 %v2191_v9, %v2672_v47 }
  0xa8   : > { %v1379_v58 = vadd.f32 %v1246_v50, %v975_v41  ;;  %v941_v60 = vadd.f32 %v909_v56, %v876_v42  ;;  %v683_v61 = vmul.f32 %v2191_v9, %v2675_v15  ;;  %v747_v62 = vmul.f32 %v2194_v10, %v2726_v44 }
  0xa9   : > { %v1303_v63 = vsel %vm1294_vm2, %v1270_v43, %v1286_v54  ;;  %v1319_v0 = vsel %vm1294_vm2, %v1286_v54, %v1270_v43  ;;  %v714_v4 = vadd.f32 %v682_v45, %v649_v55  ;;  %v748_v5 = vmul.f32 %v2194_v10, %v2733_v3  ;;  %v2788_v45 = vld [vmem:[%s2162_s22 + $0xb0] sm:$0xff] }
  0xaa   : > { %v1411_v7 = vadd.f32 %v1379_v58, %v1303_v63  ;;  %v976_v16 = vadd.f32 %v2229_v29, %v941_v60  ;;  %v1348_v17 = vsel %vm1160_vm3, %v1319_v0, 0.0  ;;  %v715_v18 = vadd.f32 %v683_v61, %v650_v59  ;;  %v2791_v58 = vld [vmem:[%s2162_s22 + $0xb8] sm:$0xff] }
  0xab   : > { %v779_v20 = vadd.f32 %v747_v62, %v714_v4  ;;  %v812_v21 = vmul.f32 %v2196_v11, %v2610_v46  ;;  %v845_v22 = vmul.f32 %v2198_v12, %v2672_v47  ;;  %v910_v23 = vmul.f32 %v2200_v13, %v2726_v44 }
  0xac   : > { %1443 = vst [vmem:[%s2296_s27 + $0x80] sm:$0xff] %v1411_v7  ;;  %v1380_v24 = vadd.f32 %v1202_v40, %v976_v16  ;;  %v780_v25 = vadd.f32 %v748_v5, %v715_v18  ;;  %v1010_v26 = vmul.f32 %v2213_v19, %v2610_v46  ;;  %v1011_v27 = vmul.f32 %v2213_v19, %v2617_v52 }
  0xad   : > { %v877_v28 = vadd.f32 %v845_v22, %v812_v21  ;;  %v1043_v32 = vmul.f32 %v2231_v30, %v2672_v47  ;;  %v1044_v33 = vmul.f32 %v2231_v30, %v2675_v15  ;;  %v1108_v34 = vmul.f32 %v2233_v31, %v2726_v44 }
  0xae   : > { %v1412_v35 = vadd.f32 %v1380_v24, %v1348_v17  ;;  %v1109_v49 = vmul.f32 %v2233_v31, %v2733_v3  ;;  %v1170_v53 = vrot.slane %v779_v20, 7  ;;  %v1186_v57 = vrot.slane %v780_v25, 7 }
  0xaf   : > { %v942_v46 = vadd.f32 %v910_v23, %v877_v28  ;;  %v1075_v14 = vadd.f32 %v1043_v32, %v1010_v26  ;;  %v1076_v48 = vadd.f32 %v1044_v33, %v1011_v27  ;;  %v813_v2 = vmul.f32 %v2196_v11, %v2617_v52 }
  0xb0   : > { %1444 = vst [vmem:[%s2296_s27 + $0x88] sm:$0xff] %v1412_v35  ;;  %v1219_v51 = vsel %vm1193_vm0, %v1186_v57, %v1170_v53  ;;  %v846_v36 = vmul.f32 %v2198_v12, %v2675_v15  ;;  %v911_v56 = vmul.f32 %v2200_v13, %v2733_v3  ;;  %v1203_v37 = vsel %vm1193_vm0, %v1170_v53, %v1186_v57 }
  0xb1   : > { %v977_v38 = vadd.f32 %v2229_v29, %v942_v46  ;;  %v1140_v39 = vadd.f32 %v1108_v34, %v1075_v14  ;;  %v1141_v40 = vadd.f32 %v1109_v49, %v1076_v48  ;;  %v1248_v52 = vsel %vm1157_vm1, %v1219_v51, 0.0 }
  0xb2   : > { %v878_v41 = vadd.f32 %v846_v36, %v813_v2  ;;  %v651_v50 = vmul.f32 %v2189_v8, %v2672_v47  ;;  %v652_v42 = vmul.f32 %v2189_v8, %v2675_v15  ;;  %v684_v55 = vmul.f32 %v2191_v9, %v2726_v44 }
  0xb3   : > { %v1271_v43 = vrot.slane %v1140_v39, 1  ;;  %v1287_v54 = vrot.slane %v1141_v40, 1  ;;  %v1381_v59 = vadd.f32 %v1248_v52, %v977_v38  ;;  %v685_v60 = vmul.f32 %v2191_v9, %v2733_v3 }
  0xb4   : > { %v943_v61 = vadd.f32 %v911_v56, %v878_v41  ;;  %v716_v62 = vadd.f32 %v684_v55, %v651_v50  ;;  %v749_v63 = vmul.f32 %v2194_v10, %v2788_v45  ;;  %v750_v0 = vmul.f32 %v2194_v10, %v2791_v58 }
  0xb5   : > { %v1304_v4 = vsel %vm1294_vm2, %v1271_v43, %v1287_v54  ;;  %v1320_v5 = vsel %vm1294_vm2, %v1287_v54, %v1271_v43  ;;  %v717_v7 = vadd.f32 %v685_v60, %v652_v42  ;;  %v814_v16 = vmul.f32 %v2196_v11, %v2672_v47  ;;  %v2847_v42 = vld [vmem:[%s2162_s22 + $0xc0] sm:$0xff]  ;;  %v2854_v60 = vld [vmem:[%s2162_s22 + $0xc8] sm:$0xff] }
  0xb6   : > { %v1413_v17 = vadd.f32 %v1381_v59, %v1304_v4  ;;  %v978_v18 = vadd.f32 %v2229_v29, %v943_v61  ;;  %v1350_v20 = vsel %vm1160_vm3, %v1320_v5, 0.0  ;;  %v781_v21 = vadd.f32 %v749_v63, %v716_v62 }
  0xb7   : > { %v782_v22 = vadd.f32 %v750_v0, %v717_v7  ;;  %v847_v23 = vmul.f32 %v2198_v12, %v2726_v44  ;;  %v912_v24 = vmul.f32 %v2200_v13, %v2788_v45  ;;  %v1012_v25 = vmul.f32 %v2213_v19, %v2672_v47 }
  0xb8   : > { %1445 = vst [vmem:[%s2296_s27 + $0x90] sm:$0xff] %v1413_v17  ;;  %v1382_v26 = vadd.f32 %v1203_v37, %v978_v18  ;;  %v1013_v29 = vmul.f32 %v2213_v19, %v2675_v15  ;;  %v1045_v27 = vmul.f32 %v2231_v30, %v2726_v44  ;;  %v1046_v28 = vmul.f32 %v2231_v30, %v2733_v3 }
  0xb9   : > { %v879_v32 = vadd.f32 %v847_v23, %v814_v16  ;;  %v1110_v33 = vmul.f32 %v2233_v31, %v2788_v45  ;;  %v1111_v34 = vmul.f32 %v2233_v31, %v2791_v58  ;;  %v1171_v47 = vrot.slane %v781_v21, 7 }
  0xba   : > { %v1414_v35 = vadd.f32 %v1382_v26, %v1350_v20  ;;  %v1077_v49 = vadd.f32 %v1045_v27, %v1012_v25  ;;  %v1078_v53 = vadd.f32 %v1046_v28, %v1013_v29  ;;  %v1187_v57 = vrot.slane %v782_v22, 7 }
  0xbb   : > { %v944_v46 = vadd.f32 %v912_v24, %v879_v32  ;;  %v815_v14 = vmul.f32 %v2196_v11, %v2675_v15  ;;  %v848_v48 = vmul.f32 %v2198_v12, %v2733_v3  ;;  %v913_v2 = vmul.f32 %v2200_v13, %v2791_v58  ;;  %v2839_v15 = vld [vmem:[%s3171_s4] ss:$0 sm:$0xff] }
  0xbc   : > { %1446 = vst [vmem:[%s2296_s27 + $0x98] sm:$0xff] %v1414_v35  ;;  %v1142_v51 = vadd.f32 %v1110_v33, %v1077_v49  ;;  %v1143_v36 = vadd.f32 %v1111_v34, %v1078_v53  ;;  %v1220_v56 = vsel %vm1193_vm0, %v1187_v57, %v1171_v47  ;;  %v1204_v37 = vsel %vm1193_vm0, %v1171_v47, %v1187_v57 }
  0xbd   : > { %v979_v38 = vadd.f32 %v2839_v15, %v944_v46  ;;  %v1250_v39 = vsel %vm1157_vm1, %v1220_v56, 0.0  ;;  %v880_v40 = vadd.f32 %v848_v48, %v815_v14  ;;  %v653_v52 = vmul.f32 %v2189_v8, %v2726_v44 }
  0xbe   : > { %v1272_v41 = vrot.slane %v1142_v51, 1  ;;  %v1288_v50 = vrot.slane %v1143_v36, 1  ;;  %v654_v55 = vmul.f32 %v2189_v8, %v2733_v3  ;;  %v686_v43 = vmul.f32 %v2191_v9, %v2788_v45 }
  0xbf   : > { %v1383_v54 = vadd.f32 %v1250_v39, %v979_v38  ;;  %v945_v59 = vadd.f32 %v913_v2, %v880_v40  ;;  %v687_v61 = vmul.f32 %v2191_v9, %v2791_v58  ;;  %v751_v62 = vmul.f32 %v2194_v10, %v2847_v42 }
  0xc0   : > { %v1305_v63 = vsel %vm1294_vm2, %v1272_v41, %v1288_v50  ;;  %v1321_v0 = vsel %vm1294_vm2, %v1288_v50, %v1272_v41  ;;  %v718_v4 = vadd.f32 %v686_v43, %v653_v52  ;;  %v752_v5 = vmul.f32 %v2194_v10, %v2854_v60  ;;  %v2909_v43 = vld [vmem:[%s2162_s22 + $0xd0] sm:$0xff] }
  0xc1   : > { %v1415_v7 = vadd.f32 %v1383_v54, %v1305_v63  ;;  %v980_v16 = vadd.f32 %v2839_v15, %v945_v59  ;;  %v1352_v17 = vsel %vm1160_vm3, %v1321_v0, 0.0  ;;  %v719_v18 = vadd.f32 %v687_v61, %v654_v55  ;;  %v2912_v54 = vld [vmem:[%s2162_s22 + $0xd8] sm:$0xff] }
  0xc2   : > { %v783_v20 = vadd.f32 %v751_v62, %v718_v4  ;;  %v816_v21 = vmul.f32 %v2196_v11, %v2726_v44  ;;  %v849_v22 = vmul.f32 %v2198_v12, %v2788_v45  ;;  %v914_v23 = vmul.f32 %v2200_v13, %v2847_v42 }
  0xc3   : > { %1447 = vst [vmem:[%s2296_s27 + $0xa0] sm:$0xff] %v1415_v7  ;;  %v1384_v24 = vadd.f32 %v1204_v37, %v980_v16  ;;  %v784_v25 = vadd.f32 %v752_v5, %v719_v18  ;;  %v1014_v26 = vmul.f32 %v2213_v19, %v2726_v44  ;;  %v1015_v29 = vmul.f32 %v2213_v19, %v2733_v3 }
  0xc4   : > { %v881_v27 = vadd.f32 %v849_v22, %v816_v21  ;;  %v1047_v28 = vmul.f32 %v2231_v30, %v2788_v45  ;;  %v1048_v32 = vmul.f32 %v2231_v30, %v2791_v58  ;;  %v1112_v33 = vmul.f32 %v2233_v31, %v2847_v42 }
  0xc5   : > { %v1416_v34 = vadd.f32 %v1384_v24, %v1352_v17  ;;  %v1113_v47 = vmul.f32 %v2233_v31, %v2854_v60  ;;  %v1172_v35 = vrot.slane %v783_v20, 7  ;;  %v1188_v49 = vrot.slane %v784_v25, 7 }
  0xc6   : > { %v946_v44 = vadd.f32 %v914_v23, %v881_v27  ;;  %v1079_v53 = vadd.f32 %v1047_v28, %v1014_v26  ;;  %v1080_v57 = vadd.f32 %v1048_v32, %v1015_v29  ;;  %v817_v46 = vmul.f32 %v2196_v11, %v2733_v3 }
  0xc7   : > { %1448 = vst [vmem:[%s2296_s27 + $0xa8] sm:$0xff] %v1416_v34  ;;  %v1221_v14 = vsel %vm1193_vm0, %v1188_v49, %v1172_v35  ;;  %v850_v48 = vmul.f32 %v2198_v12, %v2791_v58  ;;  %v915_v2 = vmul.f32 %v2200_v13, %v2854_v60  ;;  %v1205_v51 = vsel %vm1193_vm0, %v1172_v35, %v1188_v49 }
  0xc8   : > { %v981_v36 = vadd.f32 %v2839_v15, %v946_v44  ;;  %v1144_v56 = vadd.f32 %v1112_v33, %v1079_v53  ;;  %v1145_v37 = vadd.f32 %v1113_v47, %v1080_v57  ;;  %v1252_v3 = vsel %vm1157_vm1, %v1221_v14, 0.0 }
  0xc9   : > { %v882_v38 = vadd.f32 %v850_v48, %v817_v46  ;;  %v655_v39 = vmul.f32 %v2189_v8, %v2788_v45  ;;  %v656_v40 = vmul.f32 %v2189_v8, %v2791_v58  ;;  %v688_v52 = vmul.f32 %v2191_v9, %v2847_v42 }
  0xca   : > { %v1273_v41 = vrot.slane %v1144_v56, 1  ;;  %v1289_v50 = vrot.slane %v1145_v37, 1  ;;  %v1385_v55 = vadd.f32 %v1252_v3, %v981_v36  ;;  %v689_v59 = vmul.f32 %v2191_v9, %v2854_v60 }
  0xcb   : > { %v947_v61 = vadd.f32 %v915_v2, %v882_v38  ;;  %v720_v62 = vadd.f32 %v688_v52, %v655_v39  ;;  %v753_v63 = vmul.f32 %v2194_v10, %v2909_v43  ;;  %v754_v0 = vmul.f32 %v2194_v10, %v2912_v54 }
  0xcc   : > { %v1306_v4 = vsel %vm1294_vm2, %v1273_v41, %v1289_v50  ;;  %v1322_v5 = vsel %vm1294_vm2, %v1289_v50, %v1273_v41  ;;  %v721_v7 = vadd.f32 %v689_v59, %v656_v40  ;;  %v818_v16 = vmul.f32 %v2196_v11, %v2788_v45  ;;  %v2963_v40 = vld [vmem:[%s2162_s22 + $0xe0] sm:$0xff]  ;;  %v2970_v59 = vld [vmem:[%s2162_s22 + $0xe8] sm:$0xff] }
  0xcd   : > { %v1417_v17 = vadd.f32 %v1385_v55, %v1306_v4  ;;  %v982_v18 = vadd.f32 %v2839_v15, %v947_v61  ;;  %v1354_v20 = vsel %vm1160_vm3, %v1322_v5, 0.0  ;;  %v785_v21 = vadd.f32 %v753_v63, %v720_v62 }
  0xce   : > { %v786_v22 = vadd.f32 %v754_v0, %v721_v7  ;;  %v851_v23 = vmul.f32 %v2198_v12, %v2847_v42  ;;  %v916_v24 = vmul.f32 %v2200_v13, %v2909_v43  ;;  %v1016_v25 = vmul.f32 %v2213_v19, %v2788_v45 }
  0xcf   : > { %1449 = vst [vmem:[%s2296_s27 + $0xb0] sm:$0xff] %v1417_v17  ;;  %v1386_v26 = vadd.f32 %v1205_v51, %v982_v18  ;;  %v1017_v29 = vmul.f32 %v2213_v19, %v2791_v58  ;;  %v1049_v27 = vmul.f32 %v2231_v30, %v2847_v42  ;;  %v1050_v28 = vmul.f32 %v2231_v30, %v2854_v60 }
  0xd0   : > { %v883_v32 = vadd.f32 %v851_v23, %v818_v16  ;;  %v1114_v33 = vmul.f32 %v2233_v31, %v2909_v43  ;;  %v1115_v34 = vmul.f32 %v2233_v31, %v2912_v54  ;;  %v1173_v45 = vrot.slane %v785_v21, 7 }
  0xd1   : > { %v1418_v47 = vadd.f32 %v1386_v26, %v1354_v20  ;;  %v1081_v35 = vadd.f32 %v1049_v27, %v1016_v25  ;;  %v1082_v49 = vadd.f32 %v1050_v28, %v1017_v29  ;;  %v1189_v44 = vrot.slane %v786_v22, 7 }
  0xd2   : > { %v948_v53 = vadd.f32 %v916_v24, %v883_v32  ;;  %v819_v57 = vmul.f32 %v2196_v11, %v2791_v58  ;;  %v852_v46 = vmul.f32 %v2198_v12, %v2854_v60  ;;  %v917_v14 = vmul.f32 %v2200_v13, %v2912_v54 }
  0xd3   : > { %1450 = vst [vmem:[%s2296_s27 + $0xb8] sm:$0xff] %v1418_v47  ;;  %v1146_v48 = vadd.f32 %v1114_v33, %v1081_v35  ;;  %v1147_v2 = vadd.f32 %v1115_v34, %v1082_v49  ;;  %v1222_v51 = vsel %vm1193_vm0, %v1189_v44, %v1173_v45  ;;  %v1206_v36 = vsel %vm1193_vm0, %v1173_v45, %v1189_v44 }
  0xd4   : > { %v983_v56 = vadd.f32 %v2839_v15, %v948_v53  ;;  %v1254_v58 = vsel %vm1157_vm1, %v1222_v51, 0.0  ;;  %v884_v37 = vadd.f32 %v852_v46, %v819_v57  ;;  %v657_v3 = vmul.f32 %v2189_v8, %v2847_v42 }
  0xd5   : > { %v1274_v38 = vrot.slane %v1146_v48, 1  ;;  %v1290_v39 = vrot.slane %v1147_v2, 1  ;;  %v658_v52 = vmul.f32 %v2189_v8, %v2854_v60  ;;  %v690_v41 = vmul.f32 %v2191_v9, %v2909_v43 }
  0xd6   : > { %v1387_v50 = vadd.f32 %v1254_v58, %v983_v56  ;;  %v949_v55 = vadd.f32 %v917_v14, %v884_v37  ;;  %v691_v61 = vmul.f32 %v2191_v9, %v2912_v54  ;;  %v755_v62 = vmul.f32 %v2194_v10, %v2963_v40 }
  0xd7   : > { %v1307_v63 = vsel %vm1294_vm2, %v1274_v38, %v1290_v39  ;;  %v1323_v0 = vsel %vm1294_vm2, %v1290_v39, %v1274_v38  ;;  %v722_v4 = vadd.f32 %v690_v41, %v657_v3  ;;  %v756_v5 = vmul.f32 %v2194_v10, %v2970_v59  ;;  %v3025_v41 = vld [vmem:[%s2162_s22 + $0xf0] sm:$0xff] }
  0xd8   : > { %v1419_v7 = vadd.f32 %v1387_v50, %v1307_v63  ;;  %v984_v16 = vadd.f32 %v2839_v15, %v949_v55  ;;  %v1356_v17 = vsel %vm1160_vm3, %v1323_v0, 0.0  ;;  %v723_v18 = vadd.f32 %v691_v61, %v658_v52  ;;  %v3028_v50 = vld [vmem:[%s2162_s22 + $0xf8] sm:$0xff] }
  0xd9   : > { %v787_v20 = vadd.f32 %v755_v62, %v722_v4  ;;  %v820_v21 = vmul.f32 %v2196_v11, %v2847_v42  ;;  %v853_v22 = vmul.f32 %v2198_v12, %v2909_v43  ;;  %v918_v23 = vmul.f32 %v2200_v13, %v2963_v40 }
  0xda   : > { %1451 = vst [vmem:[%s2296_s27 + $0xc0] sm:$0xff] %v1419_v7  ;;  %v1388_v24 = vadd.f32 %v1206_v36, %v984_v16  ;;  %v788_v25 = vadd.f32 %v756_v5, %v723_v18  ;;  %v1018_v26 = vmul.f32 %v2213_v19, %v2847_v42  ;;  %v1019_v29 = vmul.f32 %v2213_v19, %v2854_v60 }
  0xdb   : > { %v885_v27 = vadd.f32 %v853_v22, %v820_v21  ;;  %v1051_v28 = vmul.f32 %v2231_v30, %v2909_v43  ;;  %v1052_v32 = vmul.f32 %v2231_v30, %v2912_v54  ;;  %v1116_v33 = vmul.f32 %v2233_v31, %v2963_v40 }
  0xdc   : > { %v1420_v34 = vadd.f32 %v1388_v24, %v1356_v17  ;;  %v1117_v45 = vmul.f32 %v2233_v31, %v2970_v59  ;;  %v1174_v47 = vrot.slane %v787_v20, 7  ;;  %v1190_v35 = vrot.slane %v788_v25, 7 }
  0xdd   : > { %v950_v42 = vadd.f32 %v918_v23, %v885_v27  ;;  %v1083_v49 = vadd.f32 %v1051_v28, %v1018_v26  ;;  %v1084_v44 = vadd.f32 %v1052_v32, %v1019_v29  ;;  %v821_v53 = vmul.f32 %v2196_v11, %v2854_v60 }
  0xde   : > { %1452 = vst [vmem:[%s2296_s27 + $0xc8] sm:$0xff] %v1420_v34  ;;  %v1223_v57 = vsel %vm1193_vm0, %v1190_v35, %v1174_v47  ;;  %v854_v46 = vmul.f32 %v2198_v12, %v2912_v54  ;;  %v919_v14 = vmul.f32 %v2200_v13, %v2970_v59  ;;  %v1207_v48 = vsel %vm1193_vm0, %v1174_v47, %v1190_v35 }
  0xdf   : > { %v985_v2 = vadd.f32 %v2839_v15, %v950_v42  ;;  %v1148_v51 = vadd.f32 %v1116_v33, %v1083_v49  ;;  %v1149_v36 = vadd.f32 %v1117_v45, %v1084_v44  ;;  %v1256_v60 = vsel %vm1157_vm1, %v1223_v57, 0.0 }
  0xe0   : > { %v886_v56 = vadd.f32 %v854_v46, %v821_v53  ;;  %v659_v58 = vmul.f32 %v2189_v8, %v2909_v43  ;;  %v660_v37 = vmul.f32 %v2189_v8, %v2912_v54  ;;  %v692_v3 = vmul.f32 %v2191_v9, %v2963_v40 }
  0xe1   : > { %v1275_v38 = vrot.slane %v1148_v51, 1  ;;  %v1291_v39 = vrot.slane %v1149_v36, 1  ;;  %v1389_v52 = vadd.f32 %v1256_v60, %v985_v2  ;;  %v693_v55 = vmul.f32 %v2191_v9, %v2970_v59 }
  0xe2   : > { %v951_v61 = vadd.f32 %v919_v14, %v886_v56  ;;  %v724_v62 = vadd.f32 %v692_v3, %v659_v58  ;;  %v757_v63 = vmul.f32 %v2194_v10, %v3025_v41  ;;  %v758_v0 = vmul.f32 %v2194_v10, %v3028_v50 }
  0xe3   : > { %v1308_v4 = vsel %vm1294_vm2, %v1275_v38, %v1291_v39  ;;  %v1324_v5 = vsel %vm1294_vm2, %v1291_v39, %v1275_v38  ;;  %v725_v7 = vadd.f32 %v693_v55, %v660_v37  ;;  %v822_v16 = vmul.f32 %v2196_v11, %v2909_v43 }
  0xe4   : > { %v1421_v17 = vadd.f32 %v1389_v52, %v1308_v4  ;;  %v986_v18 = vadd.f32 %v2839_v15, %v951_v61  ;;  %v1358_v20 = vsel %vm1160_vm3, %v1324_v5, 0.0  ;;  %v789_v21 = vadd.f32 %v757_v63, %v724_v62 }
  0xe5   : > { %v790_v22 = vadd.f32 %v758_v0, %v725_v7  ;;  %v855_v23 = vmul.f32 %v2198_v12, %v2963_v40  ;;  %v920_v24 = vmul.f32 %v2200_v13, %v3025_v41  ;;  %v1020_v25 = vmul.f32 %v2213_v19, %v2909_v43 }
  0xe6   : > { %1453 = vst [vmem:[%s2296_s27 + $0xd0] sm:$0xff] %v1421_v17  ;;  %v1390_v26 = vadd.f32 %v1207_v48, %v986_v18  ;;  %v1021_v29 = vmul.f32 %v2213_v19, %v2912_v54  ;;  %v1053_v27 = vmul.f32 %v2231_v30, %v2963_v40  ;;  %v1054_v28 = vmul.f32 %v2231_v30, %v2970_v59 }
  0xe7   : > { %v887_v32 = vadd.f32 %v855_v23, %v822_v16  ;;  %v1118_v33 = vmul.f32 %v2233_v31, %v3025_v41  ;;  %v1119_v34 = vmul.f32 %v2233_v31, %v3028_v50  ;;  %v1175_v43 = vrot.slane %v789_v21, 7 }
  0xe8   : > { %v1422_v45 = vadd.f32 %v1390_v26, %v1358_v20  ;;  %v1085_v47 = vadd.f32 %v1053_v27, %v1020_v25  ;;  %v1086_v35 = vadd.f32 %v1054_v28, %v1021_v29  ;;  %v1191_v42 = vrot.slane %v790_v22, 7 }
  0xe9   : > { %v952_v49 = vadd.f32 %v920_v24, %v887_v32  ;;  %v823_v44 = vmul.f32 %v2196_v11, %v2912_v54  ;;  %v856_v53 = vmul.f32 %v2198_v12, %v2970_v59  ;;  %v921_v57 = vmul.f32 %v2200_v13, %v3028_v50 }
  0xea   : > { %1454 = vst [vmem:[%s2296_s27 + $0xd8] sm:$0xff] %v1422_v45  ;;  %v1150_v46 = vadd.f32 %v1118_v33, %v1085_v47  ;;  %v1151_v14 = vadd.f32 %v1119_v34, %v1086_v35  ;;  %v1224_v48 = vsel %vm1193_vm0, %v1191_v42, %v1175_v43  ;;  %v1208_v2 = vsel %vm1193_vm0, %v1175_v43, %v1191_v42 }
  0xeb   : > { %v987_v51 = vadd.f32 %v2839_v15, %v952_v49  ;;  %v1258_v54 = vsel %vm1157_vm1, %v1224_v48, 0.0  ;;  %v888_v36 = vadd.f32 %v856_v53, %v823_v44  ;;  %v661_v60 = vmul.f32 %v2189_v8, %v2963_v40 }
  0xec   : > { %v1276_v56 = vrot.slane %v1150_v46, 1  ;;  %v1292_v58 = vrot.slane %v1151_v14, 1  ;;  %v662_v37 = vmul.f32 %v2189_v8, %v2970_v59  ;;  %v694_v3 = vmul.f32 %v2191_v9, %v3025_v41 }
  0xed   : > { %v1391_v38 = vadd.f32 %v1258_v54, %v987_v51  ;;  %v953_v39 = vadd.f32 %v921_v57, %v888_v36  ;;  %v695_v52 = vmul.f32 %v2191_v9, %v3028_v50  ;;  %v759_v55 = vmul.f32 0.0, %v2194_v10 }
  0xee   : > { %v1309_v61 = vsel %vm1294_vm2, %v1276_v56, %v1292_v58  ;;  %v1325_v62 = vsel %vm1294_vm2, %v1292_v58, %v1276_v56  ;;  %v726_v63 = vadd.f32 %v694_v3, %v661_v60  ;;  %v824_v8 = vmul.f32 %v2196_v11, %v2963_v40 }
  0xef   : > { %v1423_v0 = vadd.f32 %v1391_v38, %v1309_v61  ;;  %v988_v4 = vadd.f32 %v2839_v15, %v953_v39  ;;  %v1360_v5 = vsel %vm1160_vm3, %v1325_v62, 0.0  ;;  %v727_v7 = vadd.f32 %v695_v52, %v662_v37 }
  0xf0   : > { %v791_v9 = vadd.f32 %v759_v55, %v726_v63  ;;  %v857_v10 = vmul.f32 %v2198_v12, %v3025_v41  ;;  %v922_v16 = vmul.f32 0.0, %v2200_v13  ;;  %v1022_v17 = vmul.f32 %v2213_v19, %v2963_v40 }
  0xf1   : > { %1455 = vst [vmem:[%s2296_s27 + $0xe0] sm:$0xff] %v1423_v0  ;;  %v1392_v18 = vadd.f32 %v1208_v2, %v988_v4  ;;  %v792_v20 = vadd.f32 %v759_v55, %v727_v7  ;;  %v1023_v21 = vmul.f32 %v2213_v19, %v2970_v59  ;;  %v1055_v22 = vmul.f32 %v2231_v30, %v3025_v41 }
  0xf2   : > { %v889_v23 = vadd.f32 %v857_v10, %v824_v8  ;;  %v1056_v24 = vmul.f32 %v2231_v30, %v3028_v50  ;;  %v1120_v13 = vmul.f32 0.0, %v2233_v31  ;;  %v1176_v25 = vrot.slane %v791_v9, 7 }
  0xf3   : > { %v1424_v26 = vadd.f32 %v1392_v18, %v1360_v5  ;;  %v1087_v40 = vadd.f32 %v1055_v22, %v1022_v17  ;;  %v1192_v29 = vrot.slane %v792_v20, 7  ;;  %v825_v27 = vmul.f32 %v2196_v11, %v2970_v59 }
  0xf4   : > { %v954_v28 = vadd.f32 %v922_v16, %v889_v23  ;;  %v1088_v32 = vadd.f32 %v1056_v24, %v1023_v21  ;;  %v858_v19 = vmul.f32 %v2198_v12, %v3028_v50 }
  0xf5   : > { %1456 = vst [vmem:[%s2296_s27 + $0xe8] sm:$0xff] %v1424_v26  ;;  %v1152_v41 = vadd.f32 %v1120_v13, %v1087_v40  ;;  %v1225_v30 = vsel %vm1193_vm0, %v1192_v29, %v1176_v25  ;;  %v1209_v45 = vsel %vm1193_vm0, %v1176_v25, %v1192_v29 }
  0xf6   : > { %v989_v31 = vadd.f32 %v2839_v15, %v954_v28  ;;  %v1153_v33 = vadd.f32 %v1120_v13, %v1088_v32  ;;  %v1260_v34 = vsel %vm1157_vm1, %v1225_v30, 0.0  ;;  %v890_v11 = vadd.f32 %v858_v19, %v825_v27 }
  0xf7   : > { %v1277_v59 = vrot.slane %v1152_v41, 1 }
  0xf8   : > { %v1293_v12 = vrot.slane %v1153_v33, 1  ;;  %v1393_v50 = vadd.f32 %v1260_v34, %v989_v31  ;;  %v955_v43 = vadd.f32 %v922_v16, %v890_v11 }
  0xfa   : > { %v1310_v47 = vsel %vm1294_vm2, %v1277_v59, %v1293_v12  ;;  %v990_v35 = vadd.f32 %v2839_v15, %v955_v43  ;;  %v1326_v42 = vsel %vm1294_vm2, %v1293_v12, %v1277_v59 }
  0xfb   : > { %v1425_v49 = vadd.f32 %v1393_v50, %v1310_v47  ;;  %v1362_v44 = vsel %vm1160_vm3, %v1326_v42, 0.0 }
  0xfc   : > { %v1394_v53 = vadd.f32 %v1209_v45, %v990_v35 }
  0xfd   : > { %1457 = vst [vmem:[%s2296_s27 + $0xf0] sm:$0xff] %v1425_v49 }
  0xfe   : > { %v1426_v57 = vadd.f32 %v1394_v53, %v1362_v44 }
 0x100   : > { %1458 = vst [vmem:[%s2296_s27 + $0xf8] sm:$0xff] %v1426_v57 }
 0x101   : > { %1916 = shalt.err (!%p1913_p13)
}
 0x102   : > { %s1986_s16 = smov 128   ;;  %s1987_s3 = smov 8  }
 0x103   : > { %1688 = dma.vmem_to_hbm [thread:$0]  (%p2110_p0), %s1477_s21, 4096, %s1479_s25, %s1460_s26, %s1986_s16, %s1986_s16, %s1987_s3  }
 0x104 PF: > { %s3205_s1 = sld [smem:[#allocation16_spill]]  ;;  %p1705_p4 = pnand %p1651_p3, %p2114_p2 }
 0x105   : > { %s3207_s22 = sld [smem:[#allocation19_spill]] }
 0x106   : > { %p1706_p5 = pneg %p1705_p4 }
 0x10a   : > { %s1493_s0 = sand.u32 1, %s3205_s1  }
 0x10b   : > { %s1494_s18 = scalar_lea.sflag [#allocation5], %s1493_s0 }
 0x10c   : > { %1954 = dma.done.wait (%p1706_p5), %s1494_s18, 4096  }
 0x10d   : > { %1956 = vsyncadd (%p1706_p5), %s1494_s18, 4294963200  ;;  %s25_s23 = sadd.s32 1, %s3207_s22   ;;  %s3208_s24 = sld [smem:[#allocation17_spill]] }
 0x10e   : > { %p22_p1 = scmp.ge.s32.totalorder %s25_s23, 4   ;;  %s3209_s20 = sld [smem:[#allocation21_spill]] }
 0x10f   : > { %s3210_s21 = sld [smem:[#allocation18_spill]]  ;;  %s3212_s18 = smov %s1963_s19 }
 0x110   : > { %s3211_s22 = sld [smem:[#allocation20_spill]]  ;;  %24 = sbr.rel (!%p22_p1) target bundleno = 13 (0xd), region = 120 }
 0x113   : > { %s3213_s19 = smov %s3208_s24 }
 0x115   :  { %1500 = vsyncpa [#allocation4], 1 }
 0x116   :  { %1502 = vsyncpa [#allocation4 + $0x1], 1 }
 0x117   :  { %1503 = vsyncpa [#allocation7], 1 }
 0x118   :  { %1505 = vsyncpa [#allocation7 + $0x1], 1 }
 0x119   :  { %1506 = vsyncpa [#allocation10], 1 }
 0x11a   :  { %1507 = vsyncpa [#allocation5], 1 }
 0x11b   :  { %1509 = vsyncpa [#allocation5 + $0x1], 1 }

</bundles_post_ra>
